<compile_context>
chip_gen: v7x
topology: tpu7x:2x2x1
jax: 0.10.0
libtpu: 0.0.40
codegen_flags: <defaults>
</compile_context>

<pallas_src>
import math

import jax
import jax.numpy as jnp
from jax.experimental import pallas as pl
from jax.experimental.pallas import tpu as pltpu

EMBED_T = 512                    # text embed dim
EMBED_I = 768                    # image embed dim
EMBED = EMBED_T + EMBED_I        # 1280
R = 16
H_DEPTH = EMBED // R             # 80 : hidden width of each depth head
H_COMMON = EMBED_T // R          # 32 : hidden width of each common head
H_PACK = 2 * H_DEPTH             # 160: packed hidden lanes (img || txt)
B1_PAD = 256                     # b2 starts at a lane-aligned offset
BIAS_W = B1_PAD + EMBED          # 1536: b1 in [0:H_PACK), b2 in [256:1536)
LN_EPS = 1e-5


def _gelu_exact(x):
    # torch.nn.GELU() default ("none") = exact erf-based GELU
    return 0.5 * x * (1.0 + jax.lax.erf(x * 0.7071067811865476))


# ---------------------------------------------------------------------------
# Pallas kernel: one grid step per projection depth (+1 final step for the
# common-prompt head).  Step 0 also builds the fused input from the prompt
# tables using the scalar-prefetched missing_type.
# ---------------------------------------------------------------------------
def _make_chain_kernel(B, L, M, Mp, depth):
    n_steps = depth + 1

    def kernel(mt_ref, vtab_ref, ttab_ref, ctab_ref, w1_ref, b_ref, w2_ref,
               o_ref, carry_ref, common_ref):
        d = pl.program_id(0)

        @pl.when(d == 0)
        def _init():
            vis_rows, txt_rows, com_rows = [], [], []
            for b in range(B):                      # B is tiny & static
                mt = mt_ref[b]                      # SMEM scalar read
                vis_rows.append(jnp.where(mt == 2, vtab_ref[1], vtab_ref[0]))
                txt_rows.append(jnp.where(mt == 1, ttab_ref[1], ttab_ref[0]))
                com_rows.append(
                    jnp.where(mt == 0, ctab_ref[0],
                              jnp.where(mt == 1, ctab_ref[1], ctab_ref[2])))
            fused = jnp.concatenate(
                [jnp.concatenate(vis_rows, axis=0),
                 jnp.concatenate(txt_rows, axis=0)], axis=1)       # [M, 1280]
            com = jnp.concatenate(
                [jnp.concatenate(com_rows, axis=0),
                 jnp.zeros((M, EMBED - EMBED_T), jnp.float32)], axis=1)
            if Mp > M:                              # sublane-dense row pad
                zpad = jnp.zeros((Mp - M, EMBED), jnp.float32)
                fused = jnp.concatenate([fused, zpad], axis=0)
                com = jnp.concatenate([com, zpad], axis=0)
            carry_ref[...] = fused
            common_ref[...] = com

        is_common = d == n_steps - 1

        # Shared LayerNorm statistics (gamma/beta already folded into W1/b1).
        xc = carry_ref[...]
        mu = jnp.mean(xc, axis=-1, keepdims=True)
        var = jnp.mean(jnp.square(xc - mu), axis=-1, keepdims=True)
        xln = (xc - mu) * jax.lax.rsqrt(var + LN_EPS)
        # Last grid step uses the (non-normalized) common prompt instead.
        x = jnp.where(is_common, common_ref[...], xln)

        w1 = w1_ref[0]                              # [1280, 160] bf16
        w2 = w2_ref[0]                              # [160, 1280] bf16
        b1 = b_ref[0, :, :H_PACK]                   # [1, 160]   f32
        b2 = b_ref[0, :, B1_PAD:]                   # [1, 1280]  f32

        h = jnp.dot(x.astype(w1.dtype), w1, preferred_element_type=jnp.float32)
        h = _gelu_exact(h + b1)
        y = jnp.dot(h.astype(w2.dtype), w2, preferred_element_type=jnp.float32)
        y = y + b2

        o_ref[0] = y                                # [Mp, 1280] = [img || txt]
        carry_ref[...] = y                          # input of the next depth

    return kernel


def _chain_pallas(packed, missing_type):
    B = int(missing_type.shape[0])
    L = int(packed["vis_tbl"].shape[1])
    n_steps = int(packed["w1_all"].shape[0])        # prompt_depth + 1
    M = B * L
    Mp = max(8, ((M + 7) // 8) * 8)

    kernel = _make_chain_kernel(B, L, M, Mp, n_steps - 1)
    w1_all, w2_all, b_all = packed["w1_all"], packed["w2_all"], packed["b_all"]
    vis_tbl, txt_tbl, com_tbl = (packed["vis_tbl"], packed["txt_tbl"],
                                 packed["com_tbl"])

    wbytes = (w1_all.size + w2_all.size) * w1_all.dtype.itemsize + b_all.size * 4
    tbytes = (vis_tbl.size + txt_tbl.size + com_tbl.size) * 4
    cost = pl.CostEstimate(
        flops=4 * n_steps * Mp * EMBED * H_PACK,
        transcendentals=n_steps * Mp * (H_PACK + 1),
        bytes_accessed=int(wbytes + tbytes + n_steps * Mp * EMBED * 4 + B * 4))

    out = pl.pallas_call(
        kernel,
        out_shape=jax.ShapeDtypeStruct((n_steps, Mp, EMBED), jnp.float32),
        grid_spec=pltpu.PrefetchScalarGridSpec(
            num_scalar_prefetch=1,                  # missing_type -> SMEM
            grid=(n_steps,),
            in_specs=[
                # prompt tables: whole-array blocks, fetched once (fixed index)
                pl.BlockSpec(tuple(vis_tbl.shape), lambda d, mt: (0, 0, 0)),
                pl.BlockSpec(tuple(txt_tbl.shape), lambda d, mt: (0, 0, 0)),
                pl.BlockSpec(tuple(com_tbl.shape), lambda d, mt: (0, 0, 0)),
                # per-step weights / coalesced biases: streamed along the grid
                pl.BlockSpec((1, EMBED, H_PACK), lambda d, mt: (d, 0, 0)),
                pl.BlockSpec((1, 1, BIAS_W), lambda d, mt: (d, 0, 0)),
                pl.BlockSpec((1, H_PACK, EMBED), lambda d, mt: (d, 0, 0)),
            ],
            out_specs=pl.BlockSpec((1, Mp, EMBED), lambda d, mt: (d, 0, 0)),
            scratch_shapes=[pltpu.VMEM((Mp, EMBED), jnp.float32),   # carry
                            pltpu.VMEM((Mp, EMBED), jnp.float32)]), # common in
        compiler_params=pltpu.CompilerParams(
            dimension_semantics=("arbitrary",)),
        cost_estimate=cost,
    )(missing_type, vis_tbl, txt_tbl, com_tbl, w1_all, b_all, w2_all)
    return out


@jax.jit
def forward_pallas(packed, missing_type):
    B = int(missing_type.shape[0])
    L = int(packed["vis_tbl"].shape[1])
    D = int(packed["w1_all"].shape[0]) - 1
    M = B * L
    out = _chain_pallas(packed, missing_type)       # [D+1, Mp, 1280]
    imgs = [out[d, :M, :EMBED_I].reshape(B, L, EMBED_I) for d in range(D)]
    txts = [out[d, :M, EMBED_I:].reshape(B, L, EMBED_T) for d in range(D)]
    cimg = out[D, :M, :EMBED_I].reshape(B, L, EMBED_I)
    ctxt = out[D, :M, EMBED_I:].reshape(B, L, EMBED_T)
    imgs[0] = jnp.concatenate([imgs[0], cimg], axis=1)
    txts[0] = jnp.concatenate([txts[0], ctxt], axis=1)
    return imgs, txts


# ---------------------------------------------------------------------------
# Parameter init (mirrors the PyTorch module) and packing (fold / fuse / pad)
# ---------------------------------------------------------------------------
def init_raw_params(key, prompt_length, prompt_depth, dtype=jnp.float32):
    L = prompt_length // 3
    keys = iter(jax.random.split(key, 256))

    def nrm(shape, std=0.02):
        return (std * jax.random.normal(next(keys), shape)).astype(dtype)

    def linear(din, dout):
        bound = 1.0 / math.sqrt(din)
        w = jax.random.uniform(next(keys), (din, dout),
                               minval=-bound, maxval=bound).astype(dtype)
        b = jax.random.uniform(next(keys), (dout,),
                               minval=-bound, maxval=bound).astype(dtype)
        return w, b

    def mlp(din, dh, dout):
        return linear(din, dh) + linear(dh, dout)   # (w1, b1, w2, b2)

    def ln(d):
        g = (1.0 + 0.1 * jax.random.normal(next(keys), (d,))).astype(dtype)
        b = (0.05 * jax.random.normal(next(keys), (d,))).astype(dtype)
        return g, b

    raw = dict(prompt_depth=prompt_depth)
    raw["visual_prompt_complete"] = nrm((L, EMBED_I))
    raw["visual_prompt_missing"] = nrm((L, EMBED_I))
    raw["text_prompt_complete"] = nrm((L, EMBED_T))
    raw["text_prompt_missing"] = nrm((L, EMBED_T))
    raw["common_prompt_complete"] = nrm((L, EMBED_T))
    raw["common_prompt_image"] = nrm((L, EMBED_T))
    raw["common_prompt_text"] = nrm((L, EMBED_T))
    raw["proj_text"] = [mlp(EMBED, H_DEPTH, EMBED_T) for _ in range(prompt_depth)]
    raw["ln_text"] = [ln(EMBED) for _ in range(prompt_depth)]
    raw["proj_image"] = [mlp(EMBED, H_DEPTH, EMBED_I) for _ in range(prompt_depth)]
    raw["ln_image"] = [ln(EMBED) for _ in range(prompt_depth)]
    raw["common_proj_image"] = mlp(EMBED_T, H_COMMON, EMBED_I)
    raw["common_proj_text"] = mlp(EMBED_T, H_COMMON, EMBED_T)
    return raw


def _fold_ln(w1, b1, ln_params):
    g, b = (a.astype(jnp.float32) for a in ln_params)
    return g[:, None] * w1, b1 + b @ w1


def _pack_step(img_mlp, txt_mlp, ln_img=None, ln_txt=None):
    """Fuse the (image, text) head MLPs of one step into a compact slab.

    W1 : [1280, 160] = [ img W1 (cols 0:hi) | txt W1 (cols hi:hi+ht) | 0 ]
    W2 : [160, 1280] block-diagonal; output layout [img(768) || txt(512)].
    bias: [1, 1536]  = b1 at lanes [0:160), b2 at lanes [256:1536).
    LN affines (if given) are folded into W1/b1.
    """
    w1i, b1i, w2i, b2i = [a.astype(jnp.float32) for a in img_mlp]
    w1t, b1t, w2t, b2t = [a.astype(jnp.float32) for a in txt_mlp]
    if ln_img is not None:
        w1i, b1i = _fold_ln(w1i, b1i, ln_img)
        w1t, b1t = _fold_ln(w1t, b1t, ln_txt)
    din_i, hi = w1i.shape
    din_t, ht = w1t.shape
    doi = w2i.shape[1]
    w1 = jnp.zeros((EMBED, H_PACK), jnp.float32)
    w1 = w1.at[:din_i, :hi].set(w1i).at[:din_t, hi:hi + ht].set(w1t)
    w2 = jnp.zeros((H_PACK, EMBED), jnp.float32)
    w2 = w2.at[:hi, :doi].set(w2i).at[hi:hi + ht, doi:].set(w2t)
    bias = jnp.zeros((1, BIAS_W), jnp.float32)
    bias = bias.at[0, :hi].set(b1i).at[0, hi:hi + ht].set(b1t)
    bias = bias.at[0, B1_PAD:B1_PAD + doi].set(b2i).at[0, B1_PAD + doi:].set(b2t)
    return w1, w2, bias


def pack_params(raw, weight_dtype=jnp.bfloat16):
    D = raw["prompt_depth"]
    w1s, w2s, bs = [], [], []
    for d in range(D):
        w1, w2, b = _pack_step(raw["proj_image"][d], raw["proj_text"][d],
                               ln_img=raw["ln_image"][d],
                               ln_txt=raw["ln_text"][d])
        w1s.append(w1); w2s.append(w2); bs.append(b)
    w1c, w2c, bc = _pack_step(raw["common_proj_image"], raw["common_proj_text"])
    w1s.append(w1c); w2s.append(w2c); bs.append(bc)
    return dict(
        w1_all=jnp.stack(w1s).astype(weight_dtype),    # [D+1, 1280, 160]
        w2_all=jnp.stack(w2s).astype(weight_dtype),    # [D+1, 160, 1280]
        b_all=jnp.stack(bs),                           # [D+1, 1, 1536] f32
        vis_tbl=jnp.stack([raw["visual_prompt_complete"],
                           raw["visual_prompt_missing"]]).astype(jnp.float32),
        txt_tbl=jnp.stack([raw["text_prompt_complete"],
                           raw["text_prompt_missing"]]).astype(jnp.float32),
        com_tbl=jnp.stack([raw["common_prompt_complete"],
                           raw["common_prompt_image"],
                           raw["common_prompt_text"]]).astype(jnp.float32))


# ---------------------------------------------------------------------------
# References: packed/same-precision XLA mirror + faithful f32 per-sample port
# ---------------------------------------------------------------------------
def forward_packed_reference(packed, missing_type):
    mt = jnp.asarray(missing_type, jnp.int32)
    B = int(mt.shape[0]); L = int(packed["vis_tbl"].shape[1])
    D = int(packed["w1_all"].shape[0]) - 1
    M = B * L

    def step(x, idx, use_ln):
        x = x.astype(jnp.float32)
        if use_ln:
            mu = jnp.mean(x, axis=-1, keepdims=True)
            var = jnp.mean(jnp.square(x - mu), axis=-1, keepdims=True)
            x = (x - mu) * jax.lax.rsqrt(var + LN_EPS)
        w1 = packed["w1_all"][idx]; w2 = packed["w2_all"][idx]
        b1 = packed["b_all"][idx, :, :H_PACK]
        b2 = packed["b_all"][idx, :, B1_PAD:]
        h = _gelu_exact(jnp.dot(x.astype(w1.dtype), w1,
                                preferred_element_type=jnp.float32) + b1)
        return jnp.dot(h.astype(w2.dtype), w2,
                       preferred_element_type=jnp.float32) + b2

    vis = packed["vis_tbl"][jnp.where(mt == 2, 1, 0)]
    txt = packed["txt_tbl"][jnp.where(mt == 1, 1, 0)]
    com = packed["com_tbl"][mt]
    x = jnp.concatenate([vis, txt], axis=-1).reshape(M, EMBED)

    imgs, txts = [], []
    for d in range(D):
        x = step(x, d, use_ln=True)
        imgs.append(x[:, :EMBED_I].reshape(B, L, EMBED_I))
        txts.append(x[:, EMBED_I:].reshape(B, L, EMBED_T))
    cx = jnp.concatenate([com.reshape(M, EMBED_T),
                          jnp.zeros((M, EMBED - EMBED_T), jnp.float32)], axis=-1)
    cy = step(cx, D, use_ln=False)
    imgs[0] = jnp.concatenate([imgs[0], cy[:, :EMBED_I].reshape(B, L, EMBED_I)], 1)
    txts[0] = jnp.concatenate([txts[0], cy[:, EMBED_I:].reshape(B, L, EMBED_T)], 1)
    return imgs, txts


def forward_reference(raw, missing_type):
    D = raw["prompt_depth"]

    def ln(x, p):
        g, b = p
        mu = jnp.mean(x, axis=-1, keepdims=True)
        var = jnp.mean(jnp.square(x - mu), axis=-1, keepdims=True)
        return (x - mu) * jax.lax.rsqrt(var + LN_EPS) * g + b

    def mlp(x, p):
        w1, b1, w2, b2 = p
        return _gelu_exact(x @ w1 + b1) @ w2 + b2

    all_img = [[] for _ in range(D)]
    all_txt = [[] for _ in range(D)]
    for i, m in enumerate(int(v) for v in missing_type):
        if m == 0:
            pv, pt, pc = (raw["visual_prompt_complete"], raw["text_prompt_complete"],
                          raw["common_prompt_complete"])
        elif m == 1:
            pv, pt, pc = (raw["visual_prompt_complete"], raw["text_prompt_missing"],
                          raw["common_prompt_image"])
        else:
            pv, pt, pc = (raw["visual_prompt_missing"], raw["text_prompt_complete"],
                          raw["common_prompt_text"])
        x = jnp.concatenate([pv, pt], -1)
        all_img[0].append(mlp(ln(x, raw["ln_image"][0]), raw["proj_image"][0]))
        all_txt[0].append(mlp(ln(x, raw["ln_text"][0]), raw["proj_text"][0]))
        for d in range(1, D):
            x = jnp.concatenate([all_img[d - 1][-1], all_txt[d - 1][-1]], -1)
            all_img[d].append(mlp(ln(x, raw["ln_image"][d]), raw["proj_image"][d]))
            all_txt[d].append(mlp(ln(x, raw["ln_text"][d]), raw["proj_text"][d]))
        all_img[0][i] = jnp.concatenate(
            [all_img[0][i], mlp(pc, raw["common_proj_image"])], 0)
        all_txt[0][i] = jnp.concatenate(
            [all_txt[0][i], mlp(pc, raw["common_proj_text"])], 0)
    return [jnp.stack(p) for p in all_img], [jnp.stack(p) for p in all_txt]


if __name__ == "__main__":
    key = jax.random.PRNGKey(0)
    prompt_length, prompt_depth = 6, 2              # prompt_length_half = 2
    raw = init_raw_params(key, prompt_length, prompt_depth, dtype=jnp.float32)
    packed = pack_params(raw, weight_dtype=jnp.bfloat16)

    missing_list = [0, 1, 2]                        # one sample of each case
    missing_type = jnp.asarray(missing_list, jnp.int32)

    imgs, txts = forward_pallas(packed, missing_type)
    jax.block_until_ready((imgs, txts))

    B = len(missing_list)
    L = prompt_length // 3
    assert imgs[0].shape == (B, 2 * L, EMBED_I)
    assert txts[0].shape == (B, 2 * L, EMBED_T)
    for d in range(1, prompt_depth):
        assert imgs[d].shape == (B, L, EMBED_I)
        assert txts[d].shape == (B, L, EMBED_T)

    # tight check: same packed bf16 weights, plain-XLA math (kernel correctness)
    rimgs, rtxts = forward_packed_reference(packed, missing_type)
    for a, b in zip(list(imgs) + list(txts), list(rimgs) + list(rtxts)):
        assert bool(jnp.allclose(a, b, rtol=2e-3, atol=2e-3)), \
            "mismatch vs packed (same-precision) reference"

    # loose check: faithful f32 PyTorch-style reference (bf16 streaming tolerance)
    fimgs, ftxts = forward_reference(raw, missing_list)
    for a, b in zip(list(imgs) + list(txts), list(fimgs) + list(ftxts)):
        assert bool(jnp.allclose(a, b, rtol=3e-2, atol=3e-2)), \
            "mismatch vs faithful f32 reference"

    print("KERNEL_OK")
</pallas_src>

<mosaic_0001>
module attributes {stable_mosaic.version = 11 : i64} {
  func.func @kernel(%arg0: i32, %arg1: memref<3xi32, #tpu.memory_space<smem>>, %arg2: memref<2x2x768xf32, #tpu.memory_space<vmem>>, %arg3: memref<2x2x512xf32, #tpu.memory_space<vmem>>, %arg4: memref<3x2x512xf32, #tpu.memory_space<vmem>>, %arg5: memref<1x1280x160xbf16, #tpu.memory_space<vmem>>, %arg6: memref<1x1x1536xf32, #tpu.memory_space<vmem>>, %arg7: memref<1x160x1280xbf16, #tpu.memory_space<vmem>>, %arg8: memref<1x8x1280xf32, #tpu.memory_space<vmem>>, %arg9: memref<8x1280xf32, #tpu.memory_space<vmem>>, %arg10: memref<8x1280xf32, #tpu.memory_space<vmem>>) attributes {dimension_semantics = [#tpu.dimension_semantics<arbitrary>], iteration_bounds = array<i64: 3>, scalar_prefetch = 1 : i64, scratch_operands = 2 : i64, tpu.core_type = #tpu.core_type<tc>, window_params = [{pipeline_mode = #tpu.pipeline_mode<synchronous>, transform_indices = @transform_0, window_bounds = array<i64: 2, 2, 768>}, {pipeline_mode = #tpu.pipeline_mode<synchronous>, transform_indices = @transform_1, window_bounds = array<i64: 2, 2, 512>}, {pipeline_mode = #tpu.pipeline_mode<synchronous>, transform_indices = @transform_2, window_bounds = array<i64: 3, 2, 512>}, {transform_indices = @transform_3, window_bounds = array<i64: 1, 1280, 160>}, {transform_indices = @transform_4, window_bounds = array<i64: 1, 1, 1536>}, {transform_indices = @transform_5, window_bounds = array<i64: 1, 160, 1280>}, {transform_indices = @transform_6, window_bounds = array<i64: 1, 8, 1280>}]} {
    %c0_i32 = arith.constant 0 : i32
    %0 = arith.cmpi eq, %arg0, %c0_i32 : i32
    %1 = arith.extui %0 : i1 to i32
    %c0_i32_0 = arith.constant 0 : i32
    %2 = arith.cmpi ne, %1, %c0_i32_0 : i32
    scf.if %2 {
      %c0_29 = arith.constant 0 : index
      %53 = memref.load %arg1[%c0_29] : memref<3xi32, #tpu.memory_space<smem>>
      %c2_i32_30 = arith.constant 2 : i32
      %54 = arith.cmpi eq, %53, %c2_i32_30 : i32
      %c1 = arith.constant 1 : index
      %c0_31 = arith.constant 0 : index
      %c0_32 = arith.constant 0 : index
      %55 = vector.load %arg2[%c1, %c0_31, %c0_32] : memref<2x2x768xf32, #tpu.memory_space<vmem>>, vector<1x2x768xf32>
      %56 = vector.shape_cast %55 : vector<1x2x768xf32> to vector<2x768xf32>
      %c0_33 = arith.constant 0 : index
      %c0_34 = arith.constant 0 : index
      %c0_35 = arith.constant 0 : index
      %57 = vector.load %arg2[%c0_33, %c0_34, %c0_35] : memref<2x2x768xf32, #tpu.memory_space<vmem>>, vector<1x2x768xf32>
      %58 = vector.shape_cast %57 : vector<1x2x768xf32> to vector<2x768xf32>
      %59 = arith.select %54, %56, %58 : vector<2x768xf32>
      %c1_i32 = arith.constant 1 : i32
      %60 = arith.cmpi eq, %53, %c1_i32 : i32
      %c1_36 = arith.constant 1 : index
      %c0_37 = arith.constant 0 : index
      %c0_38 = arith.constant 0 : index
      %61 = vector.load %arg3[%c1_36, %c0_37, %c0_38] : memref<2x2x512xf32, #tpu.memory_space<vmem>>, vector<1x2x512xf32>
      %62 = vector.shape_cast %61 : vector<1x2x512xf32> to vector<2x512xf32>
      %c0_39 = arith.constant 0 : index
      %c0_40 = arith.constant 0 : index
      %c0_41 = arith.constant 0 : index
      %63 = vector.load %arg3[%c0_39, %c0_40, %c0_41] : memref<2x2x512xf32, #tpu.memory_space<vmem>>, vector<1x2x512xf32>
      %64 = vector.shape_cast %63 : vector<1x2x512xf32> to vector<2x512xf32>
      %65 = arith.select %60, %62, %64 : vector<2x512xf32>
      %c0_i32_42 = arith.constant 0 : i32
      %66 = arith.cmpi eq, %53, %c0_i32_42 : i32
      %c0_43 = arith.constant 0 : index
      %c0_44 = arith.constant 0 : index
      %c0_45 = arith.constant 0 : index
      %67 = vector.load %arg4[%c0_43, %c0_44, %c0_45] : memref<3x2x512xf32, #tpu.memory_space<vmem>>, vector<1x2x512xf32>
      %68 = vector.shape_cast %67 : vector<1x2x512xf32> to vector<2x512xf32>
      %c1_i32_46 = arith.constant 1 : i32
      %69 = arith.cmpi eq, %53, %c1_i32_46 : i32
      %c1_47 = arith.constant 1 : index
      %c0_48 = arith.constant 0 : index
      %c0_49 = arith.constant 0 : index
      %70 = vector.load %arg4[%c1_47, %c0_48, %c0_49] : memref<3x2x512xf32, #tpu.memory_space<vmem>>, vector<1x2x512xf32>
      %71 = vector.shape_cast %70 : vector<1x2x512xf32> to vector<2x512xf32>
      %c2 = arith.constant 2 : index
      %c0_50 = arith.constant 0 : index
      %c0_51 = arith.constant 0 : index
      %72 = vector.load %arg4[%c2, %c0_50, %c0_51] : memref<3x2x512xf32, #tpu.memory_space<vmem>>, vector<1x2x512xf32>
      %73 = vector.shape_cast %72 : vector<1x2x512xf32> to vector<2x512xf32>
      %74 = arith.select %69, %71, %73 : vector<2x512xf32>
      %75 = arith.select %66, %68, %74 : vector<2x512xf32>
      %c1_52 = arith.constant 1 : index
      %76 = memref.load %arg1[%c1_52] : memref<3xi32, #tpu.memory_space<smem>>
      %c2_i32_53 = arith.constant 2 : i32
      %77 = arith.cmpi eq, %76, %c2_i32_53 : i32
      %c1_54 = arith.constant 1 : index
      %c0_55 = arith.constant 0 : index
      %c0_56 = arith.constant 0 : index
      %78 = vector.load %arg2[%c1_54, %c0_55, %c0_56] : memref<2x2x768xf32, #tpu.memory_space<vmem>>, vector<1x2x768xf32>
      %79 = vector.shape_cast %78 : vector<1x2x768xf32> to vector<2x768xf32>
      %c0_57 = arith.constant 0 : index
      %c0_58 = arith.constant 0 : index
      %c0_59 = arith.constant 0 : index
      %80 = vector.load %arg2[%c0_57, %c0_58, %c0_59] : memref<2x2x768xf32, #tpu.memory_space<vmem>>, vector<1x2x768xf32>
      %81 = vector.shape_cast %80 : vector<1x2x768xf32> to vector<2x768xf32>
      %82 = arith.select %77, %79, %81 : vector<2x768xf32>
      %c1_i32_60 = arith.constant 1 : i32
      %83 = arith.cmpi eq, %76, %c1_i32_60 : i32
      %c1_61 = arith.constant 1 : index
      %c0_62 = arith.constant 0 : index
      %c0_63 = arith.constant 0 : index
      %84 = vector.load %arg3[%c1_61, %c0_62, %c0_63] : memref<2x2x512xf32, #tpu.memory_space<vmem>>, vector<1x2x512xf32>
      %85 = vector.shape_cast %84 : vector<1x2x512xf32> to vector<2x512xf32>
      %c0_64 = arith.constant 0 : index
      %c0_65 = arith.constant 0 : index
      %c0_66 = arith.constant 0 : index
      %86 = vector.load %arg3[%c0_64, %c0_65, %c0_66] : memref<2x2x512xf32, #tpu.memory_space<vmem>>, vector<1x2x512xf32>
      %87 = vector.shape_cast %86 : vector<1x2x512xf32> to vector<2x512xf32>
      %88 = arith.select %83, %85, %87 : vector<2x512xf32>
      %c0_i32_67 = arith.constant 0 : i32
      %89 = arith.cmpi eq, %76, %c0_i32_67 : i32
      %c0_68 = arith.constant 0 : index
      %c0_69 = arith.constant 0 : index
      %c0_70 = arith.constant 0 : index
      %90 = vector.load %arg4[%c0_68, %c0_69, %c0_70] : memref<3x2x512xf32, #tpu.memory_space<vmem>>, vector<1x2x512xf32>
      %91 = vector.shape_cast %90 : vector<1x2x512xf32> to vector<2x512xf32>
      %c1_i32_71 = arith.constant 1 : i32
      %92 = arith.cmpi eq, %76, %c1_i32_71 : i32
      %c1_72 = arith.constant 1 : index
      %c0_73 = arith.constant 0 : index
      %c0_74 = arith.constant 0 : index
      %93 = vector.load %arg4[%c1_72, %c0_73, %c0_74] : memref<3x2x512xf32, #tpu.memory_space<vmem>>, vector<1x2x512xf32>
      %94 = vector.shape_cast %93 : vector<1x2x512xf32> to vector<2x512xf32>
      %c2_75 = arith.constant 2 : index
      %c0_76 = arith.constant 0 : index
      %c0_77 = arith.constant 0 : index
      %95 = vector.load %arg4[%c2_75, %c0_76, %c0_77] : memref<3x2x512xf32, #tpu.memory_space<vmem>>, vector<1x2x512xf32>
      %96 = vector.shape_cast %95 : vector<1x2x512xf32> to vector<2x512xf32>
      %97 = arith.select %92, %94, %96 : vector<2x512xf32>
      %98 = arith.select %89, %91, %97 : vector<2x512xf32>
      %c2_78 = arith.constant 2 : index
      %99 = memref.load %arg1[%c2_78] : memref<3xi32, #tpu.memory_space<smem>>
      %c2_i32_79 = arith.constant 2 : i32
      %100 = arith.cmpi eq, %99, %c2_i32_79 : i32
      %c1_80 = arith.constant 1 : index
      %c0_81 = arith.constant 0 : index
      %c0_82 = arith.constant 0 : index
      %101 = vector.load %arg2[%c1_80, %c0_81, %c0_82] : memref<2x2x768xf32, #tpu.memory_space<vmem>>, vector<1x2x768xf32>
      %102 = vector.shape_cast %101 : vector<1x2x768xf32> to vector<2x768xf32>
      %c0_83 = arith.constant 0 : index
      %c0_84 = arith.constant 0 : index
      %c0_85 = arith.constant 0 : index
      %103 = vector.load %arg2[%c0_83, %c0_84, %c0_85] : memref<2x2x768xf32, #tpu.memory_space<vmem>>, vector<1x2x768xf32>
      %104 = vector.shape_cast %103 : vector<1x2x768xf32> to vector<2x768xf32>
      %105 = arith.select %100, %102, %104 : vector<2x768xf32>
      %c1_i32_86 = arith.constant 1 : i32
      %106 = arith.cmpi eq, %99, %c1_i32_86 : i32
      %c1_87 = arith.constant 1 : index
      %c0_88 = arith.constant 0 : index
      %c0_89 = arith.constant 0 : index
      %107 = vector.load %arg3[%c1_87, %c0_88, %c0_89] : memref<2x2x512xf32, #tpu.memory_space<vmem>>, vector<1x2x512xf32>
      %108 = vector.shape_cast %107 : vector<1x2x512xf32> to vector<2x512xf32>
      %c0_90 = arith.constant 0 : index
      %c0_91 = arith.constant 0 : index
      %c0_92 = arith.constant 0 : index
      %109 = vector.load %arg3[%c0_90, %c0_91, %c0_92] : memref<2x2x512xf32, #tpu.memory_space<vmem>>, vector<1x2x512xf32>
      %110 = vector.shape_cast %109 : vector<1x2x512xf32> to vector<2x512xf32>
      %111 = arith.select %106, %108, %110 : vector<2x512xf32>
      %c0_i32_93 = arith.constant 0 : i32
      %112 = arith.cmpi eq, %99, %c0_i32_93 : i32
      %c0_94 = arith.constant 0 : index
      %c0_95 = arith.constant 0 : index
      %c0_96 = arith.constant 0 : index
      %113 = vector.load %arg4[%c0_94, %c0_95, %c0_96] : memref<3x2x512xf32, #tpu.memory_space<vmem>>, vector<1x2x512xf32>
      %114 = vector.shape_cast %113 : vector<1x2x512xf32> to vector<2x512xf32>
      %c1_i32_97 = arith.constant 1 : i32
      %115 = arith.cmpi eq, %99, %c1_i32_97 : i32
      %c1_98 = arith.constant 1 : index
      %c0_99 = arith.constant 0 : index
      %c0_100 = arith.constant 0 : index
      %116 = vector.load %arg4[%c1_98, %c0_99, %c0_100] : memref<3x2x512xf32, #tpu.memory_space<vmem>>, vector<1x2x512xf32>
      %117 = vector.shape_cast %116 : vector<1x2x512xf32> to vector<2x512xf32>
      %c2_101 = arith.constant 2 : index
      %c0_102 = arith.constant 0 : index
      %c0_103 = arith.constant 0 : index
      %118 = vector.load %arg4[%c2_101, %c0_102, %c0_103] : memref<3x2x512xf32, #tpu.memory_space<vmem>>, vector<1x2x512xf32>
      %119 = vector.shape_cast %118 : vector<1x2x512xf32> to vector<2x512xf32>
      %120 = arith.select %115, %117, %119 : vector<2x512xf32>
      %121 = arith.select %112, %114, %120 : vector<2x512xf32>
      %122 = tpu.concatenate %59, %82, %105 in 0 : vector<2x768xf32>, vector<2x768xf32>, vector<2x768xf32> -> vector<6x768xf32>
      %123 = tpu.concatenate %65, %88, %111 in 0 : vector<2x512xf32>, vector<2x512xf32>, vector<2x512xf32> -> vector<6x512xf32>
      %124 = tpu.concatenate %122, %123 in 1 : vector<6x768xf32>, vector<6x512xf32> -> vector<6x1280xf32>
      %125 = tpu.concatenate %75, %98, %121 in 0 : vector<2x512xf32>, vector<2x512xf32>, vector<2x512xf32> -> vector<6x512xf32>
      %cst_104 = arith.constant 0.000000e+00 : f32
      %126 = vector.broadcast %cst_104 : f32 to vector<6x768xf32>
      %127 = tpu.concatenate %125, %126 in 1 : vector<6x512xf32>, vector<6x768xf32> -> vector<6x1280xf32>
      %cst_105 = arith.constant 0.000000e+00 : f32
      %128 = vector.broadcast %cst_105 : f32 to vector<2x1280xf32>
      %129 = tpu.concatenate %124, %128 in 0 : vector<6x1280xf32>, vector<2x1280xf32> -> vector<8x1280xf32>
      %130 = tpu.concatenate %127, %128 in 0 : vector<6x1280xf32>, vector<2x1280xf32> -> vector<8x1280xf32>
      %c0_106 = arith.constant 0 : index
      %c0_107 = arith.constant 0 : index
      %131 = vector.load %arg9[%c0_106, %c0_107] : memref<8x1280xf32, #tpu.memory_space<vmem>>, vector<8x1280xf32>
      tpu.vector_store %arg9[%c0_106, %c0_107], %129 {strides = array<i32>} : memref<8x1280xf32, #tpu.memory_space<vmem>>, vector<8x1280xf32>,
      %c0_108 = arith.constant 0 : index
      %c0_109 = arith.constant 0 : index
      %132 = vector.load %arg10[%c0_108, %c0_109] : memref<8x1280xf32, #tpu.memory_space<vmem>>, vector<8x1280xf32>
      tpu.vector_store %arg10[%c0_108, %c0_109], %130 {strides = array<i32>} : memref<8x1280xf32, #tpu.memory_space<vmem>>, vector<8x1280xf32>,
    } else {
    }
    %c2_i32 = arith.constant 2 : i32
    %3 = arith.cmpi eq, %arg0, %c2_i32 : i32
    %c0 = arith.constant 0 : index
    %c0_1 = arith.constant 0 : index
    %4 = vector.load %arg9[%c0, %c0_1] : memref<8x1280xf32, #tpu.memory_space<vmem>>, vector<8x1280xf32>
    %cst = arith.constant dense<0.000000e+00> : vector<8xf32>
    %5 = vector.multi_reduction <add>, %4, %cst [1] : vector<8x1280xf32> to vector<8xf32>
    %6 = vector.shape_cast %5 : vector<8xf32> to vector<8x1xf32>
    %cst_2 = arith.constant 1.280000e+03 : f32
    %7 = vector.broadcast %cst_2 : f32 to vector<8x1xf32>
    %8 = arith.divf %6, %7 : vector<8x1xf32>
    %9 = vector.broadcast %8 : vector<8x1xf32> to vector<8x1280xf32>
    %10 = arith.subf %4, %9 : vector<8x1280xf32>
    %11 = arith.mulf %10, %10 : vector<8x1280xf32>
    %cst_3 = arith.constant dense<0.000000e+00> : vector<8xf32>
    %12 = vector.multi_reduction <add>, %11, %cst_3 [1] : vector<8x1280xf32> to vector<8xf32>
    %13 = vector.shape_cast %12 : vector<8xf32> to vector<8x1xf32>
    %cst_4 = arith.constant 1.280000e+03 : f32
    %14 = vector.broadcast %cst_4 : f32 to vector<8x1xf32>
    %15 = arith.divf %13, %14 : vector<8x1xf32>
    %16 = vector.broadcast %8 : vector<8x1xf32> to vector<8x1280xf32>
    %17 = arith.subf %4, %16 : vector<8x1280xf32>
    %cst_5 = arith.constant 9.99999974E-6 : f32
    %18 = vector.broadcast %cst_5 : f32 to vector<8x1xf32>
    %19 = arith.addf %15, %18 : vector<8x1xf32>
    %20 = math.rsqrt %19 : vector<8x1xf32>
    %21 = vector.broadcast %20 : vector<8x1xf32> to vector<8x1280xf32>
    %22 = arith.mulf %17, %21 : vector<8x1280xf32>
    %c0_6 = arith.constant 0 : index
    %c0_7 = arith.constant 0 : index
    %23 = vector.load %arg10[%c0_6, %c0_7] : memref<8x1280xf32, #tpu.memory_space<vmem>>, vector<8x1280xf32>
    %24 = arith.select %3, %23, %22 : vector<8x1280xf32>
    %c0_8 = arith.constant 0 : index
    %c0_9 = arith.constant 0 : index
    %c0_10 = arith.constant 0 : index
    %25 = vector.load %arg5[%c0_8, %c0_9, %c0_10] : memref<1x1280x160xbf16, #tpu.memory_space<vmem>>, vector<1x1280x160xbf16>
    %26 = vector.shape_cast %25 : vector<1x1280x160xbf16> to vector<1280x160xbf16>
    %c0_11 = arith.constant 0 : index
    %c0_12 = arith.constant 0 : index
    %c0_13 = arith.constant 0 : index
    %27 = vector.load %arg7[%c0_11, %c0_12, %c0_13] : memref<1x160x1280xbf16, #tpu.memory_space<vmem>>, vector<1x160x1280xbf16>
    %28 = vector.shape_cast %27 : vector<1x160x1280xbf16> to vector<160x1280xbf16>
    %c0_14 = arith.constant 0 : index
    %c0_15 = arith.constant 0 : index
    %c0_16 = arith.constant 0 : index
    %29 = vector.load %arg6[%c0_14, %c0_15, %c0_16] : memref<1x1x1536xf32, #tpu.memory_space<vmem>>, vector<1x1x160xf32>
    %30 = vector.shape_cast %29 : vector<1x1x160xf32> to vector<1x160xf32>
    %c0_17 = arith.constant 0 : index
    %c0_18 = arith.constant 0 : index
    %c256 = arith.constant 256 : index
    %31 = vector.load %arg6[%c0_17, %c0_18, %c256] : memref<1x1x1536xf32, #tpu.memory_space<vmem>>, vector<1x1x1280xf32>
    %32 = vector.shape_cast %31 : vector<1x1x1280xf32> to vector<1x1280xf32>
    %33 = arith.truncf %24 : vector<8x1280xf32> to vector<8x1280xbf16>
    %cst_19 = arith.constant dense<0.000000e+00> : vector<8x160xf32>
    %34 = tpu.matmul %33, %26, %cst_19 {dimension_numbers = #tpu.dot_dimension_numbers<[1], [0], [0], [1], [0, 0, 1, 1], [], []>} : vector<8x1280xbf16>, vector<1280x160xbf16>, vector<8x160xf32> -> vector<8x160xf32>
    %35 = vector.broadcast %30 : vector<1x160xf32> to vector<8x160xf32>
    %36 = arith.addf %34, %35 : vector<8x160xf32>
    %cst_20 = arith.constant 5.000000e-01 : f32
    %37 = vector.broadcast %cst_20 : f32 to vector<8x160xf32>
    %38 = arith.mulf %37, %36 : vector<8x160xf32>
    %cst_21 = arith.constant 0.707106769 : f32
    %39 = vector.broadcast %cst_21 : f32 to vector<8x160xf32>
    %40 = arith.mulf %36, %39 : vector<8x160xf32>
    %41 = math.erf %40 : vector<8x160xf32>
    %cst_22 = arith.constant 1.000000e+00 : f32
    %42 = vector.broadcast %cst_22 : f32 to vector<8x160xf32>
    %43 = arith.addf %42, %41 : vector<8x160xf32>
    %44 = arith.mulf %38, %43 : vector<8x160xf32>
    %45 = arith.truncf %44 : vector<8x160xf32> to vector<8x160xbf16>
    %cst_23 = arith.constant dense<0.000000e+00> : vector<8x1280xf32>
    %46 = tpu.matmul %45, %28, %cst_23 {dimension_numbers = #tpu.dot_dimension_numbers<[1], [0], [0], [1], [0, 0, 1, 1], [], []>} : vector<8x160xbf16>, vector<160x1280xbf16>, vector<8x1280xf32> -> vector<8x1280xf32>
    %47 = vector.broadcast %32 : vector<1x1280xf32> to vector<8x1280xf32>
    %48 = arith.addf %46, %47 : vector<8x1280xf32>
    %c0_24 = arith.constant 0 : index
    %c0_25 = arith.constant 0 : index
    %c0_26 = arith.constant 0 : index
    %49 = vector.load %arg8[%c0_24, %c0_25, %c0_26] : memref<1x8x1280xf32, #tpu.memory_space<vmem>>, vector<1x8x1280xf32>
    %50 = vector.shape_cast %49 : vector<1x8x1280xf32> to vector<8x1280xf32>
    %51 = vector.shape_cast %48 : vector<8x1280xf32> to vector<1x8x1280xf32>
    tpu.vector_store %arg8[%c0_24, %c0_25, %c0_26], %51 {strides = array<i32>} : memref<1x8x1280xf32, #tpu.memory_space<vmem>>, vector<1x8x1280xf32>,
    %c0_27 = arith.constant 0 : index
    %c0_28 = arith.constant 0 : index
    %52 = vector.load %arg9[%c0_27, %c0_28] : memref<8x1280xf32, #tpu.memory_space<vmem>>, vector<8x1280xf32>
    tpu.vector_store %arg9[%c0_27, %c0_28], %48 {strides = array<i32>} : memref<8x1280xf32, #tpu.memory_space<vmem>>, vector<8x1280xf32>,
    return
  }
  func.func @transform_0(%arg0: i32, %arg1: memref<3xi32, #tpu.memory_space<smem>>) -> (i32, i32, i32) {
    %c0_i32 = arith.constant 0 : i32
    %c0_i32_0 = arith.constant 0 : i32
    %c0_i32_1 = arith.constant 0 : i32
    %c0_i32_2 = arith.constant 0 : i32
    return %c0_i32, %c0_i32_0, %c0_i32_1 : i32, i32, i32
  }
  func.func @transform_1(%arg0: i32, %arg1: memref<3xi32, #tpu.memory_space<smem>>) -> (i32, i32, i32) {
    %c0_i32 = arith.constant 0 : i32
    %c0_i32_0 = arith.constant 0 : i32
    %c0_i32_1 = arith.constant 0 : i32
    %c0_i32_2 = arith.constant 0 : i32
    return %c0_i32, %c0_i32_0, %c0_i32_1 : i32, i32, i32
  }
  func.func @transform_2(%arg0: i32, %arg1: memref<3xi32, #tpu.memory_space<smem>>) -> (i32, i32, i32) {
    %c0_i32 = arith.constant 0 : i32
    %c0_i32_0 = arith.constant 0 : i32
    %c0_i32_1 = arith.constant 0 : i32
    %c0_i32_2 = arith.constant 0 : i32
    return %c0_i32, %c0_i32_0, %c0_i32_1 : i32, i32, i32
  }
  func.func @transform_3(%arg0: i32, %arg1: memref<3xi32, #tpu.memory_space<smem>>) -> (i32, i32, i32) {
    %c0_i32 = arith.constant 0 : i32
    %c0_i32_0 = arith.constant 0 : i32
    %c0_i32_1 = arith.constant 0 : i32
    return %arg0, %c0_i32, %c0_i32_0 : i32, i32, i32
  }
  func.func @transform_4(%arg0: i32, %arg1: memref<3xi32, #tpu.memory_space<smem>>) -> (i32, i32, i32) {
    %c0_i32 = arith.constant 0 : i32
    %c0_i32_0 = arith.constant 0 : i32
    %c0_i32_1 = arith.constant 0 : i32
    return %arg0, %c0_i32, %c0_i32_0 : i32, i32, i32
  }
  func.func @transform_5(%arg0: i32, %arg1: memref<3xi32, #tpu.memory_space<smem>>) -> (i32, i32, i32) {
    %c0_i32 = arith.constant 0 : i32
    %c0_i32_0 = arith.constant 0 : i32
    %c0_i32_1 = arith.constant 0 : i32
    return %arg0, %c0_i32, %c0_i32_0 : i32, i32, i32
  }
  func.func @transform_6(%arg0: i32, %arg1: memref<3xi32, #tpu.memory_space<smem>>) -> (i32, i32, i32) {
    %c0_i32 = arith.constant 0 : i32
    %c0_i32_0 = arith.constant 0 : i32
    %c0_i32_1 = arith.constant 0 : i32
    return %arg0, %c0_i32, %c0_i32_0 : i32, i32, i32
  }
}

</mosaic_0001>

<bundles_post_ra>
// kernel: squeeze.7
= control target key start
LH: loop header
LB: loop body
LE: loop exit
PB: predicated region body
PF: predicated region fallthrough
CT: control target
= control target key end

     0   :  { %2 = vsyncpa [#allocation1], 0  ;;  %s253_s0 = inlined_call_operand.vmem [shape: f32[1,6,768], index: 0, kind: input, shape index: {}]   ;;  %s254_s1 = inlined_call_operand.hbm [shape: f32[3,2,768], index: 1, kind: output, shape index: {}]  }
   0x1   :  { %v3_v0 = vld [vmem:[%s253_s0] sm:$0x3f]   ;;  %v182_v1 = vld [vmem:[%s253_s0 + $0x8] sm:$0x3f]   ;;  %v183_v2 = vld [vmem:[%s253_s0 + $0x10] sm:$0x3f]  }
   0x2   :  { %4 = vst [vmem:[#allocation2] sm:$0x3] %v3_v0   ;;  %6 = vst [vmem:[#allocation2 + $0x2e] sm:$0xc] %v3_v0   ;;  %v184_v3 = vld [vmem:[%s253_s0 + $0x18] sm:$0x3f]  }
   0x3   :  { %8 = vst [vmem:[#allocation2 + $0x5c] sm:$0x30] %v3_v0   ;;  %12 = vst [vmem:[#allocation2 + $0x8] sm:$0x3] %v182_v1   ;;  %v185_v4 = vld [vmem:[%s253_s0 + $0x20] sm:$0x3f]  }
   0x4   :  { %14 = vst [vmem:[#allocation2 + $0x36] sm:$0xc] %v182_v1   ;;  %16 = vst [vmem:[#allocation2 + $0x64] sm:$0x30] %v182_v1   ;;  %v186_v5 = vld [vmem:[%s253_s0 + $0x28] sm:$0x3f]  }
   0x5   :  { %20 = vst [vmem:[#allocation2 + $0x10] sm:$0x3] %v183_v2   ;;  %22 = vst [vmem:[#allocation2 + $0x3e] sm:$0xc] %v183_v2   ;;  %s212_s0 = smov [#allocation0]  }
   0x6   :  { %24 = vst [vmem:[#allocation2 + $0x6c] sm:$0x30] %v183_v2   ;;  %28 = vst [vmem:[#allocation2 + $0x18] sm:$0x3] %v184_v3   ;;  %s160_s18 = sshll.u32 %s212_s0, 4  ;;  %s161_s18 = int_to_ptr.vmem [resolvable:$true] %s160_s18 }
   0x7   :  { %30 = vst [vmem:[#allocation2 + $0x46] sm:$0xc] %v184_v3   ;;  %32 = vst [vmem:[#allocation2 + $0x74] sm:$0x30] %v184_v3   ;;  %s188_s19 = scalar_lea.vmem %s161_s18, 576  ;;  %p193_p1 = scmp.lt.s32.totalorder %s161_s18, %s161_s18 }
   0x8   :  { %36 = vst [vmem:[#allocation2 + $0x20] sm:$0x3] %v185_v4   ;;  %38 = vst [vmem:[#allocation2 + $0x4e] sm:$0xc] %v185_v4   ;;  %p189_p0 = scmp.ne.s32.totalorder %s161_s18, %s188_s19  ;;  %p194_p2 = scmp.lt.s32.totalorder %s188_s19, %s188_s19 }
   0x9   :  { %40 = vst [vmem:[#allocation2 + $0x7c] sm:$0x30] %v185_v4   ;;  %44 = vst [vmem:[#allocation2 + $0x28] sm:$0x3] %v186_v5   ;;  %v52_v6 = vld [vmem:[#allocation2] sm:$0x3] }
   0xa   :  { %46 = vst [vmem:[#allocation2 + $0x56] sm:$0xc] %v186_v5   ;;  %48 = vst [vmem:[#allocation2 + $0x84] sm:$0x30] %v186_v5   ;;  %v56_v7 = vld [vmem:[#allocation2 + $0x8] sm:$0x3]  ;;  %p195_p3 = por %p194_p2, %p193_p1 }
   0xb   :  { %v85_v8 = vld [vmem:[#allocation2 + $0x30] sm:$0x3]  ;;  %54 = vst [vmem:[#allocation0] sm:$0x3] %v52_v6  ;;  %59 = vst [vmem:[#allocation0 + $0x2] sm:$0x3] %v56_v7 }
   0xc   :  { %v61_v9 = vld [vmem:[#allocation2 + $0x10] sm:$0x3]  ;;  %89 = vst [vmem:[#allocation0 + $0xc] sm:$0x3] %v85_v8  ;;  %v91_v13 = vld [vmem:[#allocation2 + $0x38] sm:$0x3]  ;;  %p196_p4 = pnand %p195_p3, %p189_p0 }
   0xd   :  { %v67_v10 = vld [vmem:[#allocation2 + $0x18] sm:$0x3]  ;;  %65 = vst [vmem:[#allocation0 + $0x4] sm:$0x3] %v61_v9  ;;  %v97_v14 = vld [vmem:[#allocation2 + $0x40] sm:$0x3] }
   0xe   :  { %71 = vst [vmem:[#allocation0 + $0x6] sm:$0x3] %v67_v10  ;;  %95 = vst [vmem:[#allocation0 + $0xe] sm:$0x3] %v91_v13  ;;  %v103_v15 = vld [vmem:[#allocation2 + $0x48] sm:$0x3] }
   0xf   :  { %v73_v11 = vld [vmem:[#allocation2 + $0x20] sm:$0x3]  ;;  %101 = vst [vmem:[#allocation0 + $0x10] sm:$0x3] %v97_v14  ;;  %v109_v16 = vld [vmem:[#allocation2 + $0x50] sm:$0x3] }
  0x10   :  { %77 = vst [vmem:[#allocation0 + $0x8] sm:$0x3] %v73_v11  ;;  %v79_v12 = vld [vmem:[#allocation2 + $0x28] sm:$0x3]  ;;  %107 = vst [vmem:[#allocation0 + $0x12] sm:$0x3] %v103_v15 }
  0x11   :  { %83 = vst [vmem:[#allocation0 + $0xa] sm:$0x3] %v79_v12  ;;  %v115_v17 = vld [vmem:[#allocation2 + $0x58] sm:$0x3]  ;;  %113 = vst [vmem:[#allocation0 + $0x14] sm:$0x3] %v109_v16 }
  0x12   :  { %119 = vst [vmem:[#allocation0 + $0x16] sm:$0x3] %v115_v17  ;;  %v121_v18 = vld [vmem:[#allocation2 + $0x60] sm:$0x3]  ;;  %v127_v19 = vld [vmem:[#allocation2 + $0x68] sm:$0x3] }
  0x13   :  { %v133_v20 = vld [vmem:[#allocation2 + $0x70] sm:$0x3]  ;;  %125 = vst [vmem:[#allocation0 + $0x18] sm:$0x3] %v121_v18  ;;  %131 = vst [vmem:[#allocation0 + $0x1a] sm:$0x3] %v127_v19 }
  0x14   :  { %137 = vst [vmem:[#allocation0 + $0x1c] sm:$0x3] %v133_v20  ;;  %v139_v21 = vld [vmem:[#allocation2 + $0x78] sm:$0x3]  ;;  %v145_v22 = vld [vmem:[#allocation2 + $0x80] sm:$0x3] }
  0x15   :  { %v151_v23 = vld [vmem:[#allocation2 + $0x88] sm:$0x3]  ;;  %143 = vst [vmem:[#allocation0 + $0x1e] sm:$0x3] %v139_v21  ;;  %149 = vst [vmem:[#allocation0 + $0x20] sm:$0x3] %v145_v22 }
  0x16   :  { %155 = vst [vmem:[#allocation0 + $0x22] sm:$0x3] %v151_v23 }
  0x17   :  { %199 = shalt.err (!%p196_p4)
}
  0x18   :  { %s200_s22 = scalar_lea.hbm %s254_s1, 576 }
  0x19   :  { %p201_p5 = scmp.ne.s32.totalorder %s254_s1, %s200_s22  ;;  %p204_p6 = scmp.lt.u32.totalorder %s200_s22, %s254_s1 }
  0x1b   :  { %p206_p7 = pnand %p204_p6, %p201_p5 }
  0x1d   :  { %209 = shalt.err (!%p206_p7)
}
  0x1e   :  { %163 = dma.vmem_to_hbm [thread:$0]  %s161_s18, 576, %s254_s1, [#allocation1]  }
  0x1f   :  { %210 = dma.done.wait [#allocation1], 576  }
  0x20   :  { %211 = vsyncadd [#allocation1], 4294966720 }
  0x21   :  { %165 = vsyncpa [#allocation1], 1 }

// kernel: squeeze.9
= control target key start
LH: loop header
LB: loop body
LE: loop exit
PB: predicated region body
PF: predicated region fallthrough
CT: control target
= control target key end

     0   :  { %2 = vsyncpa [#allocation1], 0  ;;  %s187_s0 = inlined_call_operand.vmem [shape: f32[1,6,512], index: 0, kind: input, shape index: {}]   ;;  %s188_s1 = inlined_call_operand.hbm [shape: f32[3,2,512], index: 1, kind: output, shape index: {}]  }
   0x1   :  { %v3_v0 = vld [vmem:[%s187_s0] sm:$0x3f]   ;;  %v124_v1 = vld [vmem:[%s187_s0 + $0x8] sm:$0x3f]   ;;  %v125_v2 = vld [vmem:[%s187_s0 + $0x10] sm:$0x3f]  }
   0x2   :  { %4 = vst [vmem:[#allocation2] sm:$0x3] %v3_v0   ;;  %6 = vst [vmem:[#allocation2 + $0x1e] sm:$0xc] %v3_v0   ;;  %v126_v3 = vld [vmem:[%s187_s0 + $0x18] sm:$0x3f]  }
   0x3   :  { %8 = vst [vmem:[#allocation2 + $0x3c] sm:$0x30] %v3_v0   ;;  %12 = vst [vmem:[#allocation2 + $0x8] sm:$0x3] %v124_v1   ;;  %s152_s0 = smov [#allocation0]  }
   0x4   :  { %14 = vst [vmem:[#allocation2 + $0x26] sm:$0xc] %v124_v1   ;;  %16 = vst [vmem:[#allocation2 + $0x44] sm:$0x30] %v124_v1   ;;  %s108_s14 = sshll.u32 %s152_s0, 4  ;;  %s109_s14 = int_to_ptr.vmem [resolvable:$true] %s108_s14 }
   0x5   :  { %20 = vst [vmem:[#allocation2 + $0x10] sm:$0x3] %v125_v2   ;;  %22 = vst [vmem:[#allocation2 + $0x2e] sm:$0xc] %v125_v2   ;;  %s128_s15 = scalar_lea.vmem %s109_s14, 384  ;;  %p133_p1 = scmp.lt.s32.totalorder %s109_s14, %s109_s14 }
   0x6   :  { %24 = vst [vmem:[#allocation2 + $0x4c] sm:$0x30] %v125_v2   ;;  %28 = vst [vmem:[#allocation2 + $0x18] sm:$0x3] %v126_v3   ;;  %p129_p0 = scmp.ne.s32.totalorder %s109_s14, %s128_s15  ;;  %p134_p2 = scmp.lt.s32.totalorder %s128_s15, %s128_s15 }
   0x7   :  { %30 = vst [vmem:[#allocation2 + $0x36] sm:$0xc] %v126_v3   ;;  %32 = vst [vmem:[#allocation2 + $0x54] sm:$0x30] %v126_v3  }
   0x8   :  { %p135_p3 = por %p134_p2, %p133_p1 }
   0x9   :  { %v36_v4 = vld [vmem:[#allocation2] sm:$0x3] }
   0xa   :  { %v40_v5 = vld [vmem:[#allocation2 + $0x8] sm:$0x3]  ;;  %v57_v6 = vld [vmem:[#allocation2 + $0x20] sm:$0x3]  ;;  %38 = vst [vmem:[#allocation0] sm:$0x3] %v36_v4  ;;  %p136_p4 = pnand %p135_p3, %p129_p0 }
   0xb   :  { %43 = vst [vmem:[#allocation0 + $0x2] sm:$0x3] %v40_v5  ;;  %61 = vst [vmem:[#allocation0 + $0x8] sm:$0x3] %v57_v6  ;;  %v63_v9 = vld [vmem:[#allocation2 + $0x28] sm:$0x3] }
   0xc   :  { %v45_v7 = vld [vmem:[#allocation2 + $0x10] sm:$0x3]  ;;  %67 = vst [vmem:[#allocation0 + $0xa] sm:$0x3] %v63_v9  ;;  %v81_v12 = vld [vmem:[#allocation2 + $0x40] sm:$0x3] }
   0xd   :  { %v51_v8 = vld [vmem:[#allocation2 + $0x18] sm:$0x3]  ;;  %49 = vst [vmem:[#allocation0 + $0x4] sm:$0x3] %v45_v7  ;;  %v69_v10 = vld [vmem:[#allocation2 + $0x30] sm:$0x3] }
   0xe   :  { %55 = vst [vmem:[#allocation0 + $0x6] sm:$0x3] %v51_v8  ;;  %v75_v11 = vld [vmem:[#allocation2 + $0x38] sm:$0x3]  ;;  %73 = vst [vmem:[#allocation0 + $0xc] sm:$0x3] %v69_v10 }
   0xf   :  { %79 = vst [vmem:[#allocation0 + $0xe] sm:$0x3] %v75_v11  ;;  %85 = vst [vmem:[#allocation0 + $0x10] sm:$0x3] %v81_v12  ;;  %v87_v13 = vld [vmem:[#allocation2 + $0x48] sm:$0x3] }
  0x10   :  { %v93_v14 = vld [vmem:[#allocation2 + $0x50] sm:$0x3]  ;;  %v99_v15 = vld [vmem:[#allocation2 + $0x58] sm:$0x3]  ;;  %91 = vst [vmem:[#allocation0 + $0x12] sm:$0x3] %v87_v13 }
  0x11   :  { %97 = vst [vmem:[#allocation0 + $0x14] sm:$0x3] %v93_v14  ;;  %103 = vst [vmem:[#allocation0 + $0x16] sm:$0x3] %v99_v15 }
  0x12   :  { %139 = shalt.err (!%p136_p4)
}
  0x13   :  { %s140_s18 = scalar_lea.hbm %s188_s1, 384 }
  0x14   :  { %p141_p5 = scmp.ne.s32.totalorder %s188_s1, %s140_s18  ;;  %p144_p6 = scmp.lt.u32.totalorder %s140_s18, %s188_s1 }
  0x16   :  { %p146_p7 = pnand %p144_p6, %p141_p5 }
  0x18   :  { %149 = shalt.err (!%p146_p7)
}
  0x19   :  { %111 = dma.vmem_to_hbm [thread:$0]  %s109_s14, 384, %s188_s1, [#allocation1]  }
  0x1a   :  { %150 = dma.done.wait [#allocation1], 384  }
  0x1b   :  { %151 = vsyncadd [#allocation1], 4294966912 }
  0x1c   :  { %113 = vsyncpa [#allocation1], 1 }

// kernel: squeeze.11
= control target key start
LH: loop header
LB: loop body
LE: loop exit
PB: predicated region body
PF: predicated region fallthrough
CT: control target
= control target key end

     0   :  { %s185_s0 = inlined_call_operand.vmem [shape: f32[1,6,512], index: 0, kind: input, shape index: {}]   ;;  %s186_s1 = inlined_call_operand.vmem [shape: f32[3,2,512], index: 1, kind: output, shape index: {}]  }
   0x1   :  { %v2_v0 = vld [vmem:[%s185_s0] sm:$0x3f]   ;;  %v113_v1 = vld [vmem:[%s185_s0 + $0x8] sm:$0x3f]   ;;  %v114_v2 = vld [vmem:[%s185_s0 + $0x10] sm:$0x3f]  }
   0x2   :  { %3 = vst [vmem:[#allocation0] sm:$0x3] %v2_v0   ;;  %5 = vst [vmem:[#allocation0 + $0x1e] sm:$0xc] %v2_v0   ;;  %v115_v3 = vld [vmem:[%s185_s0 + $0x18] sm:$0x3f]  }
   0x3   :  { %7 = vst [vmem:[#allocation0 + $0x3c] sm:$0x30] %v2_v0   ;;  %11 = vst [vmem:[#allocation0 + $0x8] sm:$0x3] %v113_v1  }
   0x4   :  { %13 = vst [vmem:[#allocation0 + $0x26] sm:$0xc] %v113_v1   ;;  %15 = vst [vmem:[#allocation0 + $0x44] sm:$0x30] %v113_v1  }
   0x5   :  { %19 = vst [vmem:[#allocation0 + $0x10] sm:$0x3] %v114_v2   ;;  %21 = vst [vmem:[#allocation0 + $0x2e] sm:$0xc] %v114_v2  }
   0x6   :  { %23 = vst [vmem:[#allocation0 + $0x4c] sm:$0x30] %v114_v2   ;;  %27 = vst [vmem:[#allocation0 + $0x18] sm:$0x3] %v115_v3  }
   0x7   :  { %29 = vst [vmem:[#allocation0 + $0x36] sm:$0xc] %v115_v3   ;;  %31 = vst [vmem:[#allocation0 + $0x54] sm:$0x30] %v115_v3  }
   0x9   :  { %v35_v4 = vld [vmem:[#allocation0] sm:$0x3] }
   0xa   :  { %v39_v5 = vld [vmem:[#allocation0 + $0x8] sm:$0x3]  ;;  %37 = vst [vmem:[%s186_s1] sm:$0x3] %v35_v4  ;;  %v56_v8 = vld [vmem:[#allocation0 + $0x20] sm:$0x3] }
   0xb   :  { %116 = vst [vmem:[%s186_s1 + $0x2] sm:$0x3] %v39_v5  ;;  %v62_v9 = vld [vmem:[#allocation0 + $0x28] sm:$0x3]  ;;  %119 = vst [vmem:[%s186_s1 + $0x8] sm:$0x3] %v56_v8 }
   0xc   :  { %v44_v6 = vld [vmem:[#allocation0 + $0x10] sm:$0x3]  ;;  %120 = vst [vmem:[%s186_s1 + $0xa] sm:$0x3] %v62_v9  ;;  %v80_v12 = vld [vmem:[#allocation0 + $0x40] sm:$0x3] }
   0xd   :  { %117 = vst [vmem:[%s186_s1 + $0x4] sm:$0x3] %v44_v6  ;;  %v50_v7 = vld [vmem:[#allocation0 + $0x18] sm:$0x3]  ;;  %v68_v10 = vld [vmem:[#allocation0 + $0x30] sm:$0x3] }
   0xe   :  { %118 = vst [vmem:[%s186_s1 + $0x6] sm:$0x3] %v50_v7  ;;  %v74_v11 = vld [vmem:[#allocation0 + $0x38] sm:$0x3]  ;;  %121 = vst [vmem:[%s186_s1 + $0xc] sm:$0x3] %v68_v10 }
   0xf   :  { %122 = vst [vmem:[%s186_s1 + $0xe] sm:$0x3] %v74_v11  ;;  %123 = vst [vmem:[%s186_s1 + $0x10] sm:$0x3] %v80_v12  ;;  %v86_v13 = vld [vmem:[#allocation0 + $0x48] sm:$0x3] }
  0x10   :  { %v92_v14 = vld [vmem:[#allocation0 + $0x50] sm:$0x3]  ;;  %v98_v15 = vld [vmem:[#allocation0 + $0x58] sm:$0x3]  ;;  %124 = vst [vmem:[%s186_s1 + $0x12] sm:$0x3] %v86_v13 }
  0x11   :  { %125 = vst [vmem:[%s186_s1 + $0x14] sm:$0x3] %v92_v14  ;;  %126 = vst [vmem:[%s186_s1 + $0x16] sm:$0x3] %v98_v15 }

// kernel: squeeze.10
= control target key start
LH: loop header
LB: loop body
LE: loop exit
PB: predicated region body
PF: predicated region fallthrough
CT: control target
= control target key end

     0   :  { %s275_s0 = inlined_call_operand.vmem [shape: f32[1,6,768], index: 0, kind: input, shape index: {}]   ;;  %s276_s1 = inlined_call_operand.vmem [shape: f32[3,2,768], index: 1, kind: output, shape index: {}]  }
   0x1   :  { %v2_v0 = vld [vmem:[%s275_s0] sm:$0x3f]   ;;  %v171_v1 = vld [vmem:[%s275_s0 + $0x8] sm:$0x3f]   ;;  %v172_v2 = vld [vmem:[%s275_s0 + $0x10] sm:$0x3f]  }
   0x2   :  { %3 = vst [vmem:[#allocation0] sm:$0x3] %v2_v0   ;;  %5 = vst [vmem:[#allocation0 + $0x2e] sm:$0xc] %v2_v0   ;;  %v173_v3 = vld [vmem:[%s275_s0 + $0x18] sm:$0x3f]  }
   0x3   :  { %7 = vst [vmem:[#allocation0 + $0x5c] sm:$0x30] %v2_v0   ;;  %11 = vst [vmem:[#allocation0 + $0x8] sm:$0x3] %v171_v1   ;;  %v174_v4 = vld [vmem:[%s275_s0 + $0x20] sm:$0x3f]  }
   0x4   :  { %13 = vst [vmem:[#allocation0 + $0x36] sm:$0xc] %v171_v1   ;;  %15 = vst [vmem:[#allocation0 + $0x64] sm:$0x30] %v171_v1   ;;  %v175_v5 = vld [vmem:[%s275_s0 + $0x28] sm:$0x3f]  }
   0x5   :  { %19 = vst [vmem:[#allocation0 + $0x10] sm:$0x3] %v172_v2   ;;  %21 = vst [vmem:[#allocation0 + $0x3e] sm:$0xc] %v172_v2  }
   0x6   :  { %23 = vst [vmem:[#allocation0 + $0x6c] sm:$0x30] %v172_v2   ;;  %27 = vst [vmem:[#allocation0 + $0x18] sm:$0x3] %v173_v3  }
   0x7   :  { %29 = vst [vmem:[#allocation0 + $0x46] sm:$0xc] %v173_v3   ;;  %31 = vst [vmem:[#allocation0 + $0x74] sm:$0x30] %v173_v3  }
   0x8   :  { %35 = vst [vmem:[#allocation0 + $0x20] sm:$0x3] %v174_v4   ;;  %37 = vst [vmem:[#allocation0 + $0x4e] sm:$0xc] %v174_v4  }
   0x9   :  { %39 = vst [vmem:[#allocation0 + $0x7c] sm:$0x30] %v174_v4   ;;  %43 = vst [vmem:[#allocation0 + $0x28] sm:$0x3] %v175_v5   ;;  %v51_v6 = vld [vmem:[#allocation0] sm:$0x3] }
   0xa   :  { %45 = vst [vmem:[#allocation0 + $0x56] sm:$0xc] %v175_v5   ;;  %47 = vst [vmem:[#allocation0 + $0x84] sm:$0x30] %v175_v5   ;;  %v55_v7 = vld [vmem:[#allocation0 + $0x8] sm:$0x3] }
   0xb   :  { %53 = vst [vmem:[%s276_s1] sm:$0x3] %v51_v6  ;;  %176 = vst [vmem:[%s276_s1 + $0x2] sm:$0x3] %v55_v7  ;;  %v84_v12 = vld [vmem:[#allocation0 + $0x30] sm:$0x3] }
   0xc   :  { %v60_v8 = vld [vmem:[#allocation0 + $0x10] sm:$0x3]  ;;  %v90_v13 = vld [vmem:[#allocation0 + $0x38] sm:$0x3]  ;;  %v96_v14 = vld [vmem:[#allocation0 + $0x40] sm:$0x3] }
   0xd   :  { %177 = vst [vmem:[%s276_s1 + $0x4] sm:$0x3] %v60_v8  ;;  %v66_v9 = vld [vmem:[#allocation0 + $0x18] sm:$0x3]  ;;  %181 = vst [vmem:[%s276_s1 + $0xc] sm:$0x3] %v84_v12 }
   0xe   :  { %178 = vst [vmem:[%s276_s1 + $0x6] sm:$0x3] %v66_v9  ;;  %182 = vst [vmem:[%s276_s1 + $0xe] sm:$0x3] %v90_v13  ;;  %v102_v15 = vld [vmem:[#allocation0 + $0x48] sm:$0x3] }
   0xf   :  { %v72_v10 = vld [vmem:[#allocation0 + $0x20] sm:$0x3]  ;;  %183 = vst [vmem:[%s276_s1 + $0x10] sm:$0x3] %v96_v14  ;;  %v108_v16 = vld [vmem:[#allocation0 + $0x50] sm:$0x3] }
  0x10   :  { %v78_v11 = vld [vmem:[#allocation0 + $0x28] sm:$0x3]  ;;  %179 = vst [vmem:[%s276_s1 + $0x8] sm:$0x3] %v72_v10  ;;  %184 = vst [vmem:[%s276_s1 + $0x12] sm:$0x3] %v102_v15 }
  0x11   :  { %180 = vst [vmem:[%s276_s1 + $0xa] sm:$0x3] %v78_v11  ;;  %v114_v17 = vld [vmem:[#allocation0 + $0x58] sm:$0x3]  ;;  %185 = vst [vmem:[%s276_s1 + $0x14] sm:$0x3] %v108_v16 }
  0x12   :  { %186 = vst [vmem:[%s276_s1 + $0x16] sm:$0x3] %v114_v17  ;;  %v120_v18 = vld [vmem:[#allocation0 + $0x60] sm:$0x3]  ;;  %v126_v19 = vld [vmem:[#allocation0 + $0x68] sm:$0x3] }
  0x13   :  { %v132_v20 = vld [vmem:[#allocation0 + $0x70] sm:$0x3]  ;;  %187 = vst [vmem:[%s276_s1 + $0x18] sm:$0x3] %v120_v18  ;;  %188 = vst [vmem:[%s276_s1 + $0x1a] sm:$0x3] %v126_v19 }
  0x14   :  { %189 = vst [vmem:[%s276_s1 + $0x1c] sm:$0x3] %v132_v20  ;;  %v138_v21 = vld [vmem:[#allocation0 + $0x78] sm:$0x3]  ;;  %v144_v22 = vld [vmem:[#allocation0 + $0x80] sm:$0x3] }
  0x15   :  { %v150_v23 = vld [vmem:[#allocation0 + $0x88] sm:$0x3]  ;;  %190 = vst [vmem:[%s276_s1 + $0x1e] sm:$0x3] %v138_v21  ;;  %191 = vst [vmem:[%s276_s1 + $0x20] sm:$0x3] %v144_v22 }
  0x16   :  { %192 = vst [vmem:[%s276_s1 + $0x22] sm:$0x3] %v150_v23 }

// kernel: forward_pallas.1
= control target key start
LH: loop header
LB: loop body
LE: loop exit
PB: predicated region body
PF: predicated region fallthrough
CT: control target
= control target key end

     0   :  { %s4346_s0 = inlined_call_operand.vmem [shape: s32[3], index: 0, kind: input, shape index: {}]   ;;  %s4347_s1 = inlined_call_operand.vmem [shape: f32[2,2,768], index: 1, kind: input, shape index: {}]   ;;  %s4348_s2 = inlined_call_operand.vmem [shape: f32[2,2,512], index: 2, kind: input, shape index: {}]   ;;  %s4349_s3 = inlined_call_operand.vmem [shape: f32[3,2,512], index: 3, kind: input, shape index: {}]   ;;  %s4350_s4 = inlined_call_operand.vmem [shape: bf16[3,1280,160], index: 4, kind: input, shape index: {}]   ;;  %s4351_s5 = inlined_call_operand.vmem [shape: f32[3,1,1536], index: 5, kind: input, shape index: {}]   ;;  %s4352_s6 = inlined_call_operand.vmem [shape: bf16[3,160,1280], index: 6, kind: input, shape index: {}]   ;;  %s4353_s7 = inlined_call_operand.vmem [shape: f32[3,8,1280], index: 7, kind: output, shape index: {}]  }
   0x1   :  { %s12_s26 = sshll.u32 %s4346_s0, 4  ;;  %s13_s26 = int_to_ptr.vmem [resolvable:$true] %s12_s26 }
   0x2   :  { %s3627_s27 = scalar_lea.vmem %s13_s26, 16  ;;  %p3632_p1 = scmp.lt.s32.totalorder %s13_s26, %s13_s26 }
   0x3   :  { %p3628_p0 = scmp.ne.s32.totalorder %s13_s26, %s3627_s27  ;;  %p3633_p2 = scmp.lt.s32.totalorder %s3627_s27, %s3627_s27 }
   0x5   :  { %p3634_p3 = por %p3633_p2, %p3632_p1 }
   0x7   :  { %p3635_p4 = pnand %p3634_p3, %p3628_p0 }
   0x9   :  { %3638 = shalt.err (!%p3635_p4)  }
   0xa   :  { %s3649_s28 = smov [#allocation5]  }
   0xb   :  { %15 = dma.vmem_to_smem %s13_s26, 16, %s3649_s28, [#allocation4] }
   0xc   :  { %3643 = dma.done.wait [#allocation4], 16 }
   0xd   :  { %3644 = vsyncadd [#allocation4], 4294967280 }
   0xe   :  { %17 = sfence }
   0xf   :  { %s3695_s29 = smov 0  }
  0x10 LB: > { %s3701_s0 = sadd.s32 4294967295, %s3647_s29   ;;  %p2921_p5 = scmp.ge.s32.totalorder %s3647_s29, 1  ;;  %s3647_s29 = sphi %s3695_s29, %s23_s29  }
  0x11   : > { %p238_p6 = scmp.lt.s32.totalorder %s3647_s29, 4 }
  0x13   : > { %p239_p7 = pnand %p2921_p5, %p238_p6 }
  0x14   : > { %p277_p8 = scmp.lt.s32.totalorder (!%p239_p7), %s3701_s0, 2  ;;  %p2925_p9 = scmp.ne.s32.totalorder (!%p239_p7), %s3701_s0, 0 }
  0x15   : > { %242 = sbr.rel (%p239_p7) target bundleno = 1228 (0x4cc), region = 44 }
  0x1c   : > { %s278_s30 = scalar_select %p277_p8, %s3701_s0, 2 }
  0x1d   : > { %300 = sbr.rel (%p2925_p9) target bundleno = 77 (0x4d), region = 48  ;;  %s3728_s24 = sld [smem:[#allocation5]] (!%p2925_p9)  ;;  %v374_v0 = vlaneseq (!%p2925_p9)  ;;  %v3650_v1 = vmov (!%p2925_p9), 1983009808   ;;  %v3651_v3 = vmov (!%p2925_p9), 0.0   ;;  %v2926_v6 = vld [vmem:[%s4347_s1 + $0xc] sm:$0xff] (!%p2925_p9) }
  0x1e   : > { %s3216_s8 = smul.u32 1280, %s278_s30  ;;  %s3730_s25 = sld [smem:[#allocation5 + $0x1]] (!%p2925_p9)  ;;  %v372_v2 = vunpack.c.l.s4 (!%p2925_p9), %v3650_v1  ;;  %659 = vst [vmem:[#allocation3 + $0x20] sm:$0xff] (!%p2925_p9), %v3651_v3  ;;  %660 = vst [vmem:[#allocation3 + $0x28] sm:$0xff] (!%p2925_p9), %v3651_v3  ;;  %v306_v7 = vld [vmem:[%s4347_s1] sm:$0xff] (!%p2925_p9)  ;;  %vm468_vm0 = vcmask (!%p2925_p9), 1041408  }
  0x1f   : > { %s3217_s9 = smul.u32 12, %s278_s30  ;;  %s3732_s26 = sld [smem:[#allocation5 + $0x2]] (!%p2925_p9)  ;;  %661 = vst [vmem:[#allocation3 + $0x30] sm:$0xff] (!%p2925_p9), %v3651_v3  ;;  %662 = vst [vmem:[#allocation3 + $0x38] sm:$0xff] (!%p2925_p9), %v3651_v3  ;;  %v375_v5 = vshrl.u32 (!%p2925_p9), %v374_v0, 7  ;;  %vm475_vm1 = vcmask (!%p2925_p9), 1043456  }
  0x20   : > { %s3710_s12 = scalar_lea.vmem %s4350_s4, %s3216_s8  ;;  %s3218_s13 = smul.u32 800, %s278_s30  ;;  %663 = vst [vmem:[#allocation3 + $0x40] sm:$0xff] (!%p2925_p9), %v3651_v3  ;;  %664 = vst [vmem:[#allocation3 + $0x48] sm:$0xff] (!%p2925_p9), %v3651_v3  ;;  %v373_v4 = vunpack.c.0.s8 (!%p2925_p9), %v372_v2  ;;  %vm630_vm3 = vcmask (!%p2925_p9), 1045504   ;;  %v2927_v12 = vld [vmem:[%s4347_s1 + $0x14] sm:$0xf] (!%p2925_p9) }
  0x21   : > { %s3715_s16 = scalar_lea.vmem %s4351_s5, %s3217_s9  ;;  %s3219_s17 = smul.u32 80, %s278_s30  ;;  %v307_v13 = vld [vmem:[%s4347_s1 + $0x8] sm:$0xf] (!%p2925_p9)  ;;  %v316_v58 = vld [vmem:[%s4348_s2] sm:$0xff] (!%p2925_p9) }
  0x22   : > { %s3720_s20 = scalar_lea.vmem %s4352_s6, %s3218_s13  ;;  %v3743_v8 = vsub.s32 (!%p2925_p9), %v373_v4, %v375_v5  ;;  %v2928_v57 = vld [vmem:[%s4348_s2 + $0x8] sm:$0xff] (!%p2925_p9) }
  0x23   : > { %s3725_s23 = scalar_lea.vmem %s4353_s7, %s3219_s17  ;;  %p302_p10 = scmp.eq.s32.totalorder (!%p2925_p9), %s3728_s24, 2 }
  0x24   : > { %p333_p11 = scmp.eq.s32.totalorder %s3730_s25, 2  ;;  %p313_p13 = scmp.eq.s32.totalorder %s3728_s24, 1 }
  0x25   : > { %p351_p12 = scmp.eq.s32.totalorder %s3732_s26, 2  ;;  %p339_p0 = scmp.eq.s32.totalorder %s3730_s25, 1 }
  0x26   : > { %s308_s27 = scalar_select %p302_p10, 1, 0 }
  0x27   : > { %s334_s10 = scalar_select %p333_p11, 1, 0 }
  0x28   : > { %v309_v9 = vstv %s308_s27  ;;  %s352_s11 = scalar_select %p351_p12, 1, 0 }
  0x29   : > { %vm3745_vm2 = vcmp.eq.s32.totalorder %v309_v9, 1  ;;  %v335_v11 = vstv %s334_s10  ;;  %p357_p1 = scmp.eq.s32.totalorder %s3732_s26, 1  ;;  %p321_p2 = scmp.eq.s32.totalorder %s3728_s24, 0  ;;  %v2930_v9 = vld [vmem:[%s4349_s3 + $0x10] sm:$0xff] }
  0x2a   : > { %v311_v14 = vsel %vm3745_vm2, %v2926_v6, %v306_v7  ;;  %vm336_vm4 = vcmp.eq.s32.totalorder %v335_v11, 1  ;;  %v353_v15 = vstv %s352_s11  ;;  %v312_v16 = vsel %vm3745_vm2, %v2927_v12, %v307_v13  ;;  %s3780_s18 = scalar_select %p313_p13, 1, 0 }
  0x2b   : > { %v337_v17 = vsel %vm336_vm4, %v2926_v6, %v306_v7  ;;  %vm3759_vm5 = vcmp.eq.s32.totalorder %v353_v15, 1  ;;  %v377_v19 = vrot.slane %v311_v14, %v3743_v8  ;;  %v370_v20 = vcombine.high %v311_v14, %v311_v14  ;;  %s3786_s19 = scalar_select %p339_p0, 1, 0 }
  0x2c   : > { %v355_v21 = vsel %vm3759_vm5, %v2926_v6, %v306_v7  ;;  %v403_v22 = vcombine.low %v337_v17, %v337_v17  ;;  %v417_v23 = vrot.slane %v337_v17, %v3743_v8  ;;  %v338_v24 = vsel %vm336_vm4, %v2927_v12, %v307_v13  ;;  %s3792_s21 = scalar_select %p357_p1, 1, 0  ;;  %v2929_v7 = vld [vmem:[%s4349_s3 + $0x8] sm:$0xff] }
  0x2d   : > { %v444_v25 = vrot.slane %v355_v21, %v3743_v8  ;;  %v385_v26 = vcombine.high %v377_v19, %v377_v19  ;;  %v384_v27 = vrot.slane %v370_v20, %v3743_v8  ;;  %v437_v28 = vcombine.high %v355_v21, %v355_v21  ;;  %p344_p3 = scmp.eq.s32.totalorder %s3730_s25, 0  ;;  %p362_p4 = scmp.eq.s32.totalorder %s3732_s26, 0 }
  0x2e   : > { %v410_v29 = vrot.slane %v403_v22, %v3743_v8  ;;  %v419_v30 = vcombine.high %v417_v23, %v417_v23  ;;  %v356_v31 = vsel %vm3759_vm5, %v2927_v12, %v307_v13  ;;  %v393_v32 = vrot.slane %v312_v16, %v3743_v8  ;;  %s328_s8 = scalar_select %p321_p2, 1, 0 }
  0x2f   : > { %v452_v33 = vcombine.low %v444_v25, %v444_v25  ;;  %v451_v34 = vrot.slane %v437_v28, %v3743_v8  ;;  %v471_v35 = vsel %vm468_vm0, %v384_v27, %v417_v23  ;;  %v386_v36 = vcombine.high %v384_v27, %v384_v27  ;;  %s346_s13 = scalar_select %p344_p3, 1, 0 }
  0x30   : > { %v469_v37 = vsel %vm468_vm0, %v377_v19, %v410_v29  ;;  %v418_v38 = vcombine.high %v410_v29, %v410_v29  ;;  %v420_v39 = vcombine.low %v338_v24, %v338_v24  ;;  %v460_v40 = vrot.slane %v356_v31, %v3743_v8  ;;  %s364_s25 = scalar_select %p362_p4, 1, 0 }
  0x31   : > { %v476_v41 = vsel %vm475_vm1, %v469_v37, %v452_v33  ;;  %v453_v42 = vcombine.low %v451_v34, %v451_v34  ;;  %v472_v43 = vsel %vm468_vm0, %v386_v36, %v419_v30  ;;  %v394_v44 = vcombine.high %v393_v32, %v393_v32 }
  0x32   : > { %v631_v45 = vsel %vm630_vm3, %v476_v41, 0.0  ;;  %v470_v46 = vsel %vm468_vm0, %v385_v26, %v418_v38  ;;  %v479_v47 = vsel %vm475_vm1, %v472_v43, %v451_v34  ;;  %v427_v48 = vrot.slane %v420_v39, %v3743_v8  ;;  %v322_v26 = vld [vmem:[%s4349_s3] sm:$0xff] }
  0x33   : > { %645 = vst [vmem:[#allocation2] sm:$0xff] %v631_v45  ;;  %v477_v49 = vsel %vm475_vm1, %v470_v46, %v444_v25  ;;  %v478_v50 = vsel %vm475_vm1, %v471_v35, %v453_v42  ;;  %v634_v51 = vsel %vm630_vm3, %v479_v47, 0.0  ;;  %v461_v52 = vcombine.low %v460_v40, %v460_v40 }
  0x34   : > { %v632_v53 = vsel %vm630_vm3, %v477_v49, 0.0  ;;  %v633_v54 = vsel %vm630_vm3, %v478_v50, 0.0  ;;  %648 = vst [vmem:[#allocation2 + $0x18] sm:$0xff] %v634_v51  ;;  %v473_v55 = vsel %vm468_vm0, %v393_v32, %v427_v48  ;;  %v428_v56 = vcombine.high %v427_v48, %v427_v48 }
  0x35   : > { %646 = vst [vmem:[#allocation2 + $0x8] sm:$0xff] %v632_v53  ;;  %647 = vst [vmem:[#allocation2 + $0x10] sm:$0xff] %v633_v54  ;;  %v480_v59 = vsel %vm475_vm1, %v473_v55, %v461_v52  ;;  %v318_v60 = vstv %s3780_s18  ;;  %v341_v61 = vstv %s3786_s19  ;;  %v359_v62 = vstv %s3792_s21 }
  0x36   : > { %v635_v63 = vsel %vm630_vm3, %v480_v59, 0.0  ;;  %v474_v0 = vsel %vm468_vm0, %v394_v44, %v428_v56  ;;  %vm3818_vm6 = vcmp.eq.s32.totalorder %v318_v60, 1  ;;  %vm3822_vm7 = vcmp.eq.s32.totalorder %v341_v61, 1 }
  0x37   : > { %649 = vst [vmem:[#allocation2 + $0x20] sm:$0xff] %v635_v63  ;;  %v481_v3 = vsel %vm475_vm1, %v474_v0, %v460_v40  ;;  %v320_v4 = vsel %vm3818_vm6, %v2928_v57, %v316_v58  ;;  %v343_v5 = vsel %vm3822_vm7, %v2928_v57, %v316_v58  ;;  %vm3833_vm8 = vcmp.eq.s32.totalorder %v359_v62, 1 }
  0x38   : > { %v636_v10 = vsel %vm630_vm3, %v481_v3, 0.0  ;;  %v361_v11 = vsel %vm3833_vm8, %v2928_v57, %v316_v58  ;;  %v490_v12 = vrot.slane %v320_v4, %v3743_v8  ;;  %v505_v13 = vcombine.low %v343_v5, %v343_v5 }
  0x39   : > { %650 = vst [vmem:[#allocation2 + $0x28] sm:$0xff] %v636_v10  ;;  %v534_v14 = vrot.slane %v361_v11, %v3743_v8  ;;  %v483_v15 = vcombine.high %v320_v4, %v320_v4  ;;  %v519_v16 = vrot.slane %v343_v5, %v3743_v8  ;;  %v527_v17 = vcombine.high %v361_v11, %v361_v11 }
  0x3a   : > { %v512_v18 = vrot.slane %v505_v13, %v3743_v8  ;;  %v498_v19 = vcombine.high %v490_v12, %v490_v12  ;;  %v327_v20 = vsel %vm3818_vm6, %v2929_v7, %v2930_v9  ;;  %v329_v21 = vstv %s328_s8 }
  0x3b   : > { %v542_v22 = vcombine.low %v534_v14, %v534_v14  ;;  %v497_v23 = vrot.slane %v483_v15, %v3743_v8  ;;  %v541_v24 = vrot.slane %v527_v17, %v3743_v8  ;;  %v521_v25 = vcombine.high %v519_v16, %v519_v16 }
  0x3c   : > { %v548_v27 = vsel %vm468_vm0, %v490_v12, %v512_v18  ;;  %v520_v28 = vcombine.high %v512_v18, %v512_v18  ;;  %vm330_vm9 = vcmp.eq.s32.totalorder %v329_v21, 1  ;;  %v345_v29 = vsel %vm3822_vm7, %v2929_v7, %v2930_v9 }
  0x3d   : > { %v552_v30 = vsel %vm475_vm1, %v548_v27, %v542_v22  ;;  %v543_v31 = vcombine.low %v541_v24, %v541_v24  ;;  %v550_v32 = vsel %vm468_vm0, %v497_v23, %v519_v16  ;;  %v499_v33 = vcombine.high %v497_v23, %v497_v23 }
  0x3e   : > { %v637_v34 = vsel %vm630_vm3, %v552_v30, 0.0  ;;  %v549_v35 = vsel %vm468_vm0, %v498_v19, %v520_v28  ;;  %v331_v36 = vsel %vm330_vm9, %v322_v26, %v327_v20  ;;  %v347_v37 = vstv %s346_s13 }
  0x3f   : > { %651 = vst [vmem:[#allocation2 + $0x30] sm:$0xff] %v637_v34  ;;  %v553_v38 = vsel %vm475_vm1, %v549_v35, %v534_v14  ;;  %v554_v39 = vsel %vm475_vm1, %v550_v32, %v543_v31  ;;  %v551_v40 = vsel %vm468_vm0, %v499_v33, %v521_v25  ;;  %vm348_vm10 = vcmp.eq.s32.totalorder %v347_v37, 1 }
  0x40   : > { %v638_v41 = vsel %vm630_vm3, %v553_v38, 0.0  ;;  %v639_v42 = vsel %vm630_vm3, %v554_v39, 0.0  ;;  %v555_v43 = vsel %vm475_vm1, %v551_v40, %v541_v24  ;;  %v349_v44 = vsel %vm348_vm10, %v322_v26, %v345_v29 }
  0x41   : > { %652 = vst [vmem:[#allocation2 + $0x38] sm:$0xff] %v638_v41  ;;  %653 = vst [vmem:[#allocation2 + $0x40] sm:$0xff] %v639_v42  ;;  %v640_v45 = vsel %vm630_vm3, %v555_v43, 0.0  ;;  %v363_v46 = vsel %vm3833_vm8, %v2929_v7, %v2930_v9  ;;  %v365_v47 = vstv %s364_s25  ;;  %v564_v48 = vrot.slane %v331_v36, %v3743_v8 }
  0x42   : > { %654 = vst [vmem:[#allocation2 + $0x48] sm:$0xff] %v640_v45  ;;  %vm366_vm11 = vcmp.eq.s32.totalorder %v365_v47, 1  ;;  %v579_v49 = vcombine.low %v349_v44, %v349_v44  ;;  %v557_v50 = vcombine.high %v331_v36, %v331_v36  ;;  %v593_v51 = vrot.slane %v349_v44, %v3743_v8 }
  0x43   : > { %v367_v52 = vsel %vm366_vm11, %v322_v26, %v363_v46  ;;  %v572_v53 = vcombine.high %v564_v48, %v564_v48 }
  0x44   : > { %v586_v54 = vrot.slane %v579_v49, %v3743_v8  ;;  %v608_v55 = vrot.slane %v367_v52, %v3743_v8  ;;  %v571_v56 = vrot.slane %v557_v50, %v3743_v8  ;;  %v601_v57 = vcombine.high %v367_v52, %v367_v52 }
  0x45   : > { %v595_v58 = vcombine.high %v593_v51, %v593_v51 }
  0x46   : > { %v616_v59 = vcombine.low %v608_v55, %v608_v55  ;;  %v622_v60 = vsel %vm468_vm0, %v564_v48, %v586_v54  ;;  %v594_v61 = vcombine.high %v586_v54, %v586_v54  ;;  %v615_v62 = vrot.slane %v601_v57, %v3743_v8 }
  0x47   : > { %v624_v63 = vsel %vm468_vm0, %v571_v56, %v593_v51  ;;  %v573_v0 = vcombine.high %v571_v56, %v571_v56 }
  0x48   : > { %v626_v1 = vsel %vm475_vm1, %v622_v60, %v616_v59  ;;  %v623_v2 = vsel %vm468_vm0, %v572_v53, %v594_v61  ;;  %v617_v3 = vcombine.low %v615_v62, %v615_v62 }
  0x49   : > { %v641_v4 = vsel %vm630_vm3, %v626_v1, 0.0  ;;  %v627_v5 = vsel %vm475_vm1, %v623_v2, %v608_v55  ;;  %v625_v6 = vsel %vm468_vm0, %v573_v0, %v595_v58 }
  0x4a   : > { %655 = vst [vmem:[#allocation3] sm:$0xff] %v641_v4  ;;  %v642_v7 = vsel %vm630_vm3, %v627_v5, 0.0  ;;  %v628_v9 = vsel %vm475_vm1, %v624_v63, %v617_v3  ;;  %v629_v8 = vsel %vm475_vm1, %v625_v6, %v615_v62 }
  0x4b   : > { %656 = vst [vmem:[#allocation3 + $0x8] sm:$0xff] %v642_v7  ;;  %v643_v10 = vsel %vm630_vm3, %v628_v9, 0.0  ;;  %v644_v11 = vsel %vm630_vm3, %v629_v8, 0.0 }
  0x4c   : > { %657 = vst [vmem:[#allocation3 + $0x10] sm:$0xff] %v643_v10  ;;  %658 = vst [vmem:[#allocation3 + $0x18] sm:$0xff] %v644_v11 }
  0x4d PF: > { %v3896_v12 = vld [vmem:[#allocation2] sm:$0xff]  ;;  %v3898_v13 = vld [vmem:[#allocation2 + $0x8] sm:$0xff]  ;;  %v3900_v14 = vld [vmem:[#allocation2 + $0x10] sm:$0xff]  ;;  %p665_p5 = scmp.eq.s32.totalorder %s3701_s0, 2  ;;  %vm2609_vm13 = vcmask 261120  }
  0x4e   : > { %v676_v15 = vadd.f32 %v3898_v13, %v3896_v12  ;;  %v3904_v16 = vld [vmem:[#allocation2 + $0x18] sm:$0xff]  ;;  %v3906_v17 = vld [vmem:[#allocation2 + $0x20] sm:$0xff]  ;;  %v3909_v19 = vld [vmem:[#allocation2 + $0x28] sm:$0xff] }
  0x4f   : > { %v3912_v21 = vld [vmem:[#allocation2 + $0x30] sm:$0xff]  ;;  %v3915_v23 = vld [vmem:[#allocation2 + $0x38] sm:$0xff]  ;;  %v3918_v25 = vld [vmem:[#allocation2 + $0x40] sm:$0xff]  ;;  %s743_s26 = scalar_select %p665_p5, 1, 0 }
  0x50   : > { %v677_v18 = vadd.f32 %v676_v15, %v3900_v14  ;;  %v3921_v27 = vld [vmem:[#allocation2 + $0x48] sm:$0xff]  ;;  %v3237_v35 = vld [vmem:[%s3710_s12 + $0x114] ss:$8 sps:$4 sm:$0xff]   ;;  %v3241_v37 = vld [vmem:[%s3710_s12 + $0x110] ss:$8 sps:$4 sm:$0xff]  }
  0x51   : > { %v3231_v31 = vld [vmem:[%s3710_s12 + $0x104] ss:$8 sps:$4 sm:$0xff]   ;;  %v3235_v33 = vld [vmem:[%s3710_s12 + $0x100] ss:$8 sps:$4 sm:$0xff]   ;;  %v3239_v36 = vld [vmem:[%s3710_s12 + $0x14] ss:$8 sps:$4 sm:$0xff]  }
  0x52   : > { %v678_v20 = vadd.f32 %v677_v18, %v3904_v16  ;;  %v3233_v32 = vld [vmem:[%s3710_s12 + $0x4] ss:$8 sps:$4 sm:$0xff]   ;;  %v3236_v34 = vld [vmem:[%s3710_s12] ss:$8 sps:$4 sm:$0xff]   ;;  %1881 = vmatprep.subr.bf16.mxu0 %v3231_v31  ;;  %v3242_v38 = vld [vmem:[%s3710_s12 + $0x10] ss:$8 sps:$4 sm:$0xff]  }
  0x53   : > { %1840 = vmatprep.subr.bf16.mxu1 %v3233_v32  ;;  %1882 = vmatpush1.bf16.msra.mxu0 %v3235_v33  ;;  %v3243_v39 = vld [vmem:[%s3710_s12 + $0x124] ss:$8 sps:$4 sm:$0xff]   ;;  %v3247_v41 = vld [vmem:[%s3710_s12 + $0x120] ss:$8 sps:$4 sm:$0xff]   ;;  %v3249_v43 = vld [vmem:[%s3710_s12 + $0x134] ss:$8 sps:$4 sm:$0xff]  }
  0x54   : > { %v679_v22 = vadd.f32 %v678_v20, %v3906_v17  ;;  %1841 = vmatpush1.bf16.msra.mxu1 %v3236_v34  ;;  %1883 = vmatprep.subr.bf16.mxu0 %v3237_v35  ;;  %v3245_v40 = vld [vmem:[%s3710_s12 + $0x24] ss:$8 sps:$4 sm:$0xff]   ;;  %v3248_v42 = vld [vmem:[%s3710_s12 + $0x20] ss:$8 sps:$4 sm:$0xff]   ;;  %v3251_v44 = vld [vmem:[%s3710_s12 + $0x34] ss:$8 sps:$4 sm:$0xff]  }
  0x55   : > { %1842 = vmatprep.subr.bf16.mxu1 %v3239_v36  ;;  %v3253_v45 = vld [vmem:[%s3710_s12 + $0x130] ss:$8 sps:$4 sm:$0xff]   ;;  %v3255_v47 = vld [vmem:[%s3710_s12 + $0x144] ss:$8 sps:$4 sm:$0xff]   ;;  %v3259_v49 = vld [vmem:[%s3710_s12 + $0x140] ss:$8 sps:$4 sm:$0xff]  }
  0x56   : > { %v680_v24 = vadd.f32 %v679_v22, %v3909_v19  ;;  %v3254_v46 = vld [vmem:[%s3710_s12 + $0x30] ss:$8 sps:$4 sm:$0xff]   ;;  %v3257_v48 = vld [vmem:[%s3710_s12 + $0x44] ss:$8 sps:$4 sm:$0xff]   ;;  %v3260_v50 = vld [vmem:[%s3710_s12 + $0x40] ss:$8 sps:$4 sm:$0xff]  }
  0x57   : > { %1884 = vmatpush1.bf16.msra.mxu0 %v3241_v37  ;;  %v3261_v51 = vld [vmem:[%s3710_s12 + $0x154] ss:$8 sps:$4 sm:$0xff]   ;;  %v3265_v53 = vld [vmem:[%s3710_s12 + $0x150] ss:$8 sps:$4 sm:$0xff]   ;;  %v3267_v55 = vld [vmem:[%s3710_s12 + $0x164] ss:$8 sps:$4 sm:$0xff]  }
  0x58   : > { %v681_v26 = vadd.f32 %v680_v24, %v3912_v21  ;;  %1843 = vmatpush1.bf16.msra.mxu1 %v3242_v38  ;;  %1885 = vmatprep.subr.bf16.mxu0 %v3243_v39  ;;  %v3263_v52 = vld [vmem:[%s3710_s12 + $0x54] ss:$8 sps:$4 sm:$0xff]   ;;  %v3266_v54 = vld [vmem:[%s3710_s12 + $0x50] ss:$8 sps:$4 sm:$0xff]   ;;  %v3269_v56 = vld [vmem:[%s3710_s12 + $0x64] ss:$8 sps:$4 sm:$0xff]  }
  0x59   : > { %1844 = vmatprep.subr.bf16.mxu1 %v3245_v40  ;;  %v3271_v57 = vld [vmem:[%s3710_s12 + $0x160] ss:$8 sps:$4 sm:$0xff]   ;;  %v3273_v59 = vld [vmem:[%s3710_s12 + $0x174] ss:$8 sps:$4 sm:$0xff]   ;;  %v3277_v61 = vld [vmem:[%s3710_s12 + $0x170] ss:$8 sps:$4 sm:$0xff]  }
  0x5a   : > { %v682_v28 = vadd.f32 %v681_v26, %v3915_v23  ;;  %v3272_v58 = vld [vmem:[%s3710_s12 + $0x60] ss:$8 sps:$4 sm:$0xff]   ;;  %v3275_v60 = vld [vmem:[%s3710_s12 + $0x74] ss:$8 sps:$4 sm:$0xff]   ;;  %v3278_v62 = vld [vmem:[%s3710_s12 + $0x70] ss:$8 sps:$4 sm:$0xff]  }
  0x5b   : > { %1886 = vmatpush1.bf16.msra.mxu0 %v3247_v41  ;;  %v3279_v63 = vld [vmem:[%s3710_s12 + $0x184] ss:$8 sps:$4 sm:$0xff]   ;;  %v3283_v1 = vld [vmem:[%s3710_s12 + $0x180] ss:$8 sps:$4 sm:$0xff]   ;;  %v3285_v3 = vld [vmem:[%s3710_s12 + $0x194] ss:$8 sps:$4 sm:$0xff]  }
  0x5c   : > { %v683_v29 = vadd.f32 %v682_v28, %v3918_v25  ;;  %1845 = vmatpush1.bf16.msra.mxu1 %v3248_v42  ;;  %1887 = vmatprep.subr.bf16.mxu0 %v3249_v43  ;;  %v3281_v0 = vld [vmem:[%s3710_s12 + $0x84] ss:$8 sps:$4 sm:$0xff]   ;;  %v3284_v2 = vld [vmem:[%s3710_s12 + $0x80] ss:$8 sps:$4 sm:$0xff]   ;;  %v3287_v4 = vld [vmem:[%s3710_s12 + $0x94] ss:$8 sps:$4 sm:$0xff]  }
  0x5d   : > { %1846 = vmatprep.subr.bf16.mxu1 %v3251_v44  ;;  %v3289_v5 = vld [vmem:[%s3710_s12 + $0x190] ss:$8 sps:$4 sm:$0xff]   ;;  %v3291_v7 = vld [vmem:[%s3710_s12 + $0x1a4] ss:$8 sps:$4 sm:$0xff]   ;;  %v3295_v8 = vld [vmem:[%s3710_s12 + $0x1a0] ss:$8 sps:$4 sm:$0xff]  }
  0x5e   : > { %v684_v30 = vadd.f32 %v683_v29, %v3921_v27  ;;  %v3290_v6 = vld [vmem:[%s3710_s12 + $0x90] ss:$8 sps:$4 sm:$0xff]   ;;  %v3293_v9 = vld [vmem:[%s3710_s12 + $0xa4] ss:$8 sps:$4 sm:$0xff]   ;;  %v3296_v10 = vld [vmem:[%s3710_s12 + $0xa0] ss:$8 sps:$4 sm:$0xff]  }
  0x5f   : > { %1888 = vmatpush1.bf16.msra.mxu0 %v3253_v45  ;;  %v3299_v43 = vld [vmem:[%s3710_s12 + $0xb4] ss:$8 sps:$4 sm:$0xff]   ;;  %v3301_v44 = vld [vmem:[%s3710_s12 + $0x1b0] ss:$8 sps:$4 sm:$0xff]  }
  0x60   : > { %685 = vadd.xlane.f32.xlu0 %v684_v30  ;;  %1847 = vmatpush1.bf16.msra.mxu1 %v3254_v46  ;;  %v3302_v45 = vld [vmem:[%s3710_s12 + $0xb0] ss:$8 sps:$4 sm:$0xff]   ;;  %v3303_v46 = vld [vmem:[%s3710_s12 + $0x1c4] ss:$8 sps:$4 sm:$0xff]  }
  0x61   : > { %1889 = vmatprep.subr.bf16.mxu0 %v3255_v47  ;;  %1848 = vmatprep.subr.bf16.mxu1 %v3257_v48  ;;  %v3305_v47 = vld [vmem:[%s3710_s12 + $0xc4] ss:$8 sps:$4 sm:$0xff]   ;;  %v3307_v48 = vld [vmem:[%s3710_s12 + $0x1c0] ss:$8 sps:$4 sm:$0xff]  }
  0x63   : > { %1890 = vmatpush1.bf16.msra.mxu0 %v3259_v49  ;;  %v3308_v49 = vld [vmem:[%s3710_s12 + $0xc0] ss:$8 sps:$4 sm:$0xff]  }
  0x64   : > { %1849 = vmatpush1.bf16.msra.mxu1 %v3260_v50  ;;  %1891 = vmatprep.subr.bf16.mxu0 %v3261_v51  ;;  %v3309_v50 = vld [vmem:[%s3710_s12 + $0x1d4] ss:$8 sps:$4 sm:$0xff]  }
  0x65   : > { %1850 = vmatprep.subr.bf16.mxu1 %v3263_v52  ;;  %v3311_v51 = vld [vmem:[%s3710_s12 + $0xd4] ss:$8 sps:$4 sm:$0xff]   ;;  %v3313_v52 = vld [vmem:[%s3710_s12 + $0x1d0] ss:$8 sps:$4 sm:$0xff]  }
  0x67   : > { %1892 = vmatpush1.bf16.msra.mxu0 %v3265_v53  ;;  %v3314_v53 = vld [vmem:[%s3710_s12 + $0xd0] ss:$8 sps:$4 sm:$0xff]  }
  0x68   : > { %1851 = vmatpush1.bf16.msra.mxu1 %v3266_v54  ;;  %1893 = vmatprep.subr.bf16.mxu0 %v3267_v55  ;;  %v3315_v54 = vld [vmem:[%s3710_s12 + $0x1e4] ss:$8 sps:$4 sm:$0xff]  }
  0x69   : > { %1852 = vmatprep.subr.bf16.mxu1 %v3269_v56  ;;  %v3317_v55 = vld [vmem:[%s3710_s12 + $0xe4] ss:$8 sps:$4 sm:$0xff]   ;;  %v3319_v56 = vld [vmem:[%s3710_s12 + $0x1e0] ss:$8 sps:$4 sm:$0xff]  }
  0x6b   : > { %1894 = vmatpush1.bf16.msra.mxu0 %v3271_v57  ;;  %v3320_v57 = vld [vmem:[%s3710_s12 + $0xe0] ss:$8 sps:$4 sm:$0xff]  }
  0x6c   : > { %1853 = vmatpush1.bf16.msra.mxu1 %v3272_v58  ;;  %1895 = vmatprep.subr.bf16.mxu0 %v3273_v59  ;;  %v3321_v58 = vld [vmem:[%s3710_s12 + $0x1f4] ss:$8 sps:$4 sm:$0xff]  }
  0x6d   : > { %1854 = vmatprep.subr.bf16.mxu1 %v3275_v60  ;;  %v3323_v59 = vld [vmem:[%s3710_s12 + $0xf4] ss:$8 sps:$4 sm:$0xff]   ;;  %v3325_v60 = vld [vmem:[%s3710_s12 + $0x1f0] ss:$8 sps:$4 sm:$0xff]  }
  0x6f   : > { %1896 = vmatpush1.bf16.msra.mxu0 %v3277_v61  ;;  %v3326_v61 = vld [vmem:[%s3710_s12 + $0xf0] ss:$8 sps:$4 sm:$0xff]  }
  0x70   : > { %1855 = vmatpush1.bf16.msra.mxu1 %v3278_v62  ;;  %1897 = vmatprep.subr.bf16.mxu0 %v3279_v63  ;;  %v3329_v62 = vld [vmem:[%s3710_s12 + $0x204] ss:$8 sps:$4 sm:$0xff]  }
  0x71   : > { %1856 = vmatprep.subr.bf16.mxu1 %v3281_v0 }
  0x73   : > { %1898 = vmatpush1.bf16.msra.mxu0 %v3283_v1 }
  0x74   : > { %1857 = vmatpush1.bf16.msra.mxu1 %v3284_v2  ;;  %1899 = vmatprep.subr.bf16.mxu0 %v3285_v3  ;;  %v744_v2 = vstv %s743_s26  ;;  %v734_v3 = vld [vmem:[#allocation3 + $0x8] sm:$0xff] }
  0x75   : > { %1858 = vmatprep.subr.bf16.mxu1 %v3287_v4  ;;  %vm4042_vm12 = vcmp.eq.s32.totalorder %v744_v2, 1  ;;  %v3366_v2 = vld [vmem:[%s3710_s12 + $0x2d0] ss:$8 sps:$4 sm:$0xff]  }
  0x77   : > { %1900 = vmatpush1.bf16.msra.mxu0 %v3289_v5  ;;  %v3374_v5 = vld [vmem:[%s3710_s12 + $0x2f4] ss:$8 sps:$4 sm:$0xff]  }
  0x78   : > { %1859 = vmatpush1.bf16.msra.mxu1 %v3290_v6  ;;  %1901 = vmatprep.subr.bf16.mxu0 %v3291_v7  ;;  %v736_v6 = vld [vmem:[#allocation3 + $0x18] sm:$0xff]  ;;  %v733_v7 = vld [vmem:[#allocation3] sm:$0xff] }
  0x79   : > { %1860 = vmatprep.subr.bf16.mxu1 %v3293_v9  ;;  %v735_v9 = vld [vmem:[#allocation3 + $0x10] sm:$0xff] }
  0x7b   : > { %1902 = vmatpush1.bf16.msra.mxu0 %v3295_v8 }
  0x7c   : > { %1861 = vmatpush1.bf16.msra.mxu1 %v3296_v10 }
  0x7d   : > { %1862 = vmatprep.subr.bf16.mxu1 %v3299_v43  ;;  %v3335_v43 = vld [vmem:[%s3710_s12 + $0x224] ss:$8 sps:$4 sm:$0xff]  }
  0x80   : > { %1863 = vmatpush1.bf16.msra.mxu1 %v3302_v45 }
  0x81   : > { %1864 = vmatprep.subr.bf16.mxu1 %v3305_v47  ;;  %v3341_v47 = vld [vmem:[%s3710_s12 + $0x244] ss:$8 sps:$4 sm:$0xff]  }
  0x84   : > { %1865 = vmatpush1.bf16.msra.mxu1 %v3308_v49  ;;  %v3344_v49 = vld [vmem:[%s3710_s12 + $0x254] ss:$8 sps:$4 sm:$0xff]  }
  0x85   : > { %1866 = vmatprep.subr.bf16.mxu1 %v3311_v51  ;;  %v3347_v51 = vld [vmem:[%s3710_s12 + $0x264] ss:$8 sps:$4 sm:$0xff]  }
  0x88   : > { %1867 = vmatpush1.bf16.msra.mxu1 %v3314_v53  ;;  %v3350_v53 = vld [vmem:[%s3710_s12 + $0x274] ss:$8 sps:$4 sm:$0xff]  }
  0x89   : > { %1868 = vmatprep.subr.bf16.mxu1 %v3317_v55  ;;  %v3353_v55 = vld [vmem:[%s3710_s12 + $0x284] ss:$8 sps:$4 sm:$0xff]  }
  0x8c   : > { %1869 = vmatpush1.bf16.msra.mxu1 %v3320_v57  ;;  %v3356_v57 = vld [vmem:[%s3710_s12 + $0x294] ss:$8 sps:$4 sm:$0xff]  }
  0x8d   : > { %1870 = vmatprep.subr.bf16.mxu1 %v3323_v59  ;;  %v3359_v59 = vld [vmem:[%s3710_s12 + $0x2a4] ss:$8 sps:$4 sm:$0xff]  }
  0x90   : > { %1871 = vmatpush1.bf16.msra.mxu1 %v3326_v61  ;;  %v3362_v61 = vld [vmem:[%s3710_s12 + $0x2b4] ss:$8 sps:$4 sm:$0xff]  }
  0xed   : > { %v686_v11 = vpop.xlane.xlu0 %685 }
  0xee   : > { %v688_v15 = vmul.f32 0.00078125, %v686_v11 }
  0xf0   : > { %v3971_v18 = vsub.f32 %v3896_v12, %v688_v15  ;;  %v3974_v20 = vsub.f32 %v3898_v13, %v688_v15  ;;  %v3977_v22 = vsub.f32 %v3900_v14, %v688_v15  ;;  %v3984_v28 = vsub.f32 %v3904_v16, %v688_v15 }
  0xf1   : > { %v3987_v29 = vsub.f32 %v3906_v17, %v688_v15  ;;  %v3992_v30 = vsub.f32 %v3909_v19, %v688_v15  ;;  %v3997_v32 = vsub.f32 %v3912_v21, %v688_v15  ;;  %v4002_v17 = vsub.f32 %v3915_v23, %v688_v15 }
  0xf2   : > { %v699_v24 = vmul.f32 %v3971_v18, %v3971_v18  ;;  %v700_v26 = vmul.f32 %v3974_v20, %v3974_v20  ;;  %v701_v12 = vmul.f32 %v3977_v22, %v3977_v22  ;;  %v702_v14 = vmul.f32 %v3984_v28, %v3984_v28 }
  0xf3   : > { %v703_v16 = vmul.f32 %v3987_v29, %v3987_v29  ;;  %v704_v19 = vmul.f32 %v3992_v30, %v3992_v30  ;;  %v4007_v35 = vsub.f32 %v3918_v25, %v688_v15  ;;  %v705_v21 = vmul.f32 %v3997_v32, %v3997_v32 }
  0xf4   : > { %v709_v13 = vadd.f32 %v700_v26, %v699_v24  ;;  %v4012_v37 = vsub.f32 %v3921_v27, %v688_v15  ;;  %v706_v23 = vmul.f32 %v4002_v17, %v4002_v17  ;;  %v3297_v27 = vld [vmem:[%s3710_s12 + $0x1b4] ss:$8 sps:$4 sm:$0xff]  }
  0xf5   : > { %v707_v39 = vmul.f32 %v4007_v35, %v4007_v35  ;;  %1903 = vmatprep.subr.bf16.mxu0 %v3297_v27  ;;  %v738_v24 = vld [vmem:[#allocation3 + $0x28] sm:$0xff] }
  0xf6   : > { %v710_v31 = vadd.f32 %v709_v13, %v701_v12  ;;  %v708_v40 = vmul.f32 %v4012_v37, %v4012_v37  ;;  %1904 = vmatpush1.bf16.msra.mxu0 %v3301_v44  ;;  %v737_v13 = vld [vmem:[#allocation3 + $0x20] sm:$0xff] }
  0xf7   : > { %1905 = vmatprep.subr.bf16.mxu0 %v3303_v46  ;;  %v3330_v27 = vld [vmem:[%s3710_s12 + $0x210] ss:$8 sps:$4 sm:$0xff]  }
  0xf8   : > { %v711_v33 = vadd.f32 %v710_v31, %v702_v14  ;;  %v740_v31 = vld [vmem:[#allocation3 + $0x38] sm:$0xff]  ;;  %v3336_v46 = vld [vmem:[%s3710_s12 + $0x230] ss:$8 sps:$4 sm:$0xff]  }
  0xfa   : > { %v712_v34 = vadd.f32 %v711_v33, %v703_v16  ;;  %1906 = vmatpush1.bf16.msra.mxu0 %v3307_v48  ;;  %v3339_v48 = vld [vmem:[%s3710_s12 + $0x240] ss:$8 sps:$4 sm:$0xff]  }
  0xfb   : > { %1907 = vmatprep.subr.bf16.mxu0 %v3309_v50  ;;  %v3342_v50 = vld [vmem:[%s3710_s12 + $0x250] ss:$8 sps:$4 sm:$0xff]  }
  0xfc   : > { %v713_v36 = vadd.f32 %v712_v34, %v704_v19  ;;  %v3327_v19 = vld [vmem:[%s3710_s12 + $0x200] ss:$8 sps:$4 sm:$0xff]  }
  0xfe   : > { %v714_v38 = vadd.f32 %v713_v36, %v705_v21  ;;  %1908 = vmatpush1.bf16.msra.mxu0 %v3313_v52  ;;  %v3332_v21 = vld [vmem:[%s3710_s12 + $0x214] ss:$8 sps:$4 sm:$0xff]   ;;  %v3345_v52 = vld [vmem:[%s3710_s12 + $0x260] ss:$8 sps:$4 sm:$0xff]  }
  0xff   : > { %1909 = vmatprep.subr.bf16.mxu0 %v3315_v54  ;;  %v3348_v54 = vld [vmem:[%s3710_s12 + $0x270] ss:$8 sps:$4 sm:$0xff]  }
 0x100   : > { %v715_v25 = vadd.f32 %v714_v38, %v706_v23 }
 0x102   : > { %v716_v41 = vadd.f32 %v715_v25, %v707_v39  ;;  %1910 = vmatpush1.bf16.msra.mxu0 %v3319_v56  ;;  %v742_v25 = vld [vmem:[#allocation3 + $0x48] sm:$0xff]  ;;  %v3351_v56 = vld [vmem:[%s3710_s12 + $0x280] ss:$8 sps:$4 sm:$0xff]  }
 0x103   : > { %1911 = vmatprep.subr.bf16.mxu0 %v3321_v58  ;;  %v3354_v58 = vld [vmem:[%s3710_s12 + $0x290] ss:$8 sps:$4 sm:$0xff]  }
 0x104   : > { %v717_v42 = vadd.f32 %v716_v41, %v708_v40  ;;  %v741_v40 = vld [vmem:[#allocation3 + $0x40] sm:$0xff] }
 0x106   : > { %718 = vadd.xlane.f32.xlu0 %v717_v42  ;;  %1912 = vmatpush1.bf16.msra.mxu0 %v3325_v60  ;;  %v3357_v60 = vld [vmem:[%s3710_s12 + $0x2a0] ss:$8 sps:$4 sm:$0xff]  }
 0x107   : > { %1922 = vmatprep.subr.bf16.mxu0 %v3329_v62  ;;  %v3360_v62 = vld [vmem:[%s3710_s12 + $0x2b0] ss:$8 sps:$4 sm:$0xff]  }
 0x193   : > { %v719_v63 = vpop.xlane.xlu0 %718 }
 0x194   : > { %v720_v0 = vmul.f32 0.00078125, %v719_v63  ;;  %v3365_v63 = vld [vmem:[%s3710_s12 + $0x2c4] ss:$8 sps:$4 sm:$0xff]  }
 0x196   : > { %v721_v1 = vadd.f32 1e-05, %v720_v0  ;;  %v3363_v0 = vld [vmem:[%s3710_s12 + $0x2c0] ss:$8 sps:$4 sm:$0xff]  }
 0x198   : > { %3621 = vrsqrt.f32 %v721_v1  ;;  %v3368_v1 = vld [vmem:[%s3710_s12 + $0x2d4] ss:$8 sps:$4 sm:$0xff]  }
 0x1a2   : > { %v3622_v4 = vpop.eup %3621 }
 0x1a3   : > { %v724_v8 = vmul.f32 %v3622_v4, %v3974_v20  ;;  %v726_v10 = vmul.f32 %v3622_v4, %v3984_v28  ;;  %v723_v11 = vmul.f32 %v3622_v4, %v3971_v18  ;;  %v725_v15 = vmul.f32 %v3622_v4, %v3977_v22  ;;  %v739_v20 = vld [vmem:[#allocation3 + $0x30] sm:$0xff] }
 0x1a4   : > { %v728_v26 = vmul.f32 %v3622_v4, %v3992_v30  ;;  %v727_v12 = vmul.f32 %v3622_v4, %v3987_v29  ;;  %v730_v14 = vmul.f32 %v3622_v4, %v4002_v17  ;;  %v729_v16 = vmul.f32 %v3622_v4, %v3997_v32 }
 0x1a5   : > { %v747_v28 = vsel %vm4042_vm12, %v734_v3, %v724_v8  ;;  %v749_v18 = vsel %vm4042_vm12, %v736_v6, %v726_v10  ;;  %v746_v22 = vsel %vm4042_vm12, %v733_v7, %v723_v11  ;;  %v748_v29 = vsel %vm4042_vm12, %v735_v9, %v725_v15  ;;  %v3371_v3 = vld [vmem:[%s3710_s12 + $0x2e4] ss:$8 sps:$4 sm:$0xff]   ;;  %v3372_v6 = vld [vmem:[%s3710_s12 + $0x2f0] ss:$8 sps:$4 sm:$0xff]   ;;  %v3375_v9 = vld [vmem:[%s3710_s12 + $0x300] ss:$8 sps:$4 sm:$0xff]  }
 0x1a6   : > { %v1020_v30 = vpack.c.bf16 %v747_v28, %v747_v28  ;;  %v1022_v33 = vpack.c.bf16 %v749_v18, %v749_v18  ;;  %v1019_v17 = vpack.c.bf16 %v746_v22, %v746_v22  ;;  %v1021_v34 = vpack.c.bf16 %v748_v29, %v748_v29  ;;  %v3377_v7 = vld [vmem:[%s3710_s12 + $0x304] ss:$8 sps:$4 sm:$0xff]   ;;  %v3380_v10 = vld [vmem:[%s3710_s12 + $0x314] ss:$8 sps:$4 sm:$0xff]   ;;  %v3378_v15 = vld [vmem:[%s3710_s12 + $0x310] ss:$8 sps:$4 sm:$0xff]  }
 0x1a7   : > { %v751_v32 = vsel %vm4042_vm12, %v738_v24, %v728_v26  ;;  %v4068_v36 = vsel %vm4042_vm12, %v737_v13, %v727_v12  ;;  %v4072_v23 = vsel %vm4042_vm12, %v740_v31, %v730_v14  ;;  %v4076_v38 = vsel %vm4042_vm12, %v739_v20, %v729_v16  ;;  %v3383_v24 = vld [vmem:[%s3710_s12 + $0x324] ss:$8 sps:$4 sm:$0xff]   ;;  %v3381_v26 = vld [vmem:[%s3710_s12 + $0x320] ss:$8 sps:$4 sm:$0xff]   ;;  %v3386_v12 = vld [vmem:[%s3710_s12 + $0x334] ss:$8 sps:$4 sm:$0xff]  }
 0x1a8   : > { %1872 = vmatprep.mubr.bf16.mxu1 %v1020_v30  ;;  %1913 = vmatprep.mubr.bf16.mxu0 %v1022_v33  ;;  %v1024_v39 = vpack.c.bf16 %v751_v32, %v751_v32  ;;  %v732_v41 = vmul.f32 %v3622_v4, %v4012_v37  ;;  %v731_v42 = vmul.f32 %v3622_v4, %v4007_v35  ;;  %v3333_v37 = vld [vmem:[%s3710_s12 + $0x220] ss:$8 sps:$4 sm:$0xff]   ;;  %v3338_v35 = vld [vmem:[%s3710_s12 + $0x234] ss:$8 sps:$4 sm:$0xff]   ;;  %v3384_v13 = vld [vmem:[%s3710_s12 + $0x330] ss:$8 sps:$4 sm:$0xff]  }
 0x1a9   : > { %1873 = vmatmul.mubr.bf16.vlgmr.msra.gmra.mrb[0].mxu1 %v1019_v17  ;;  %1914 = vmatmul.mubr.bf16.vlgmr.msra.gmra.mrb[0].mxu0 %v1021_v34  ;;  %v3369_v4 = vld [vmem:[%s3710_s12 + $0x2e0] ss:$8 sps:$4 sm:$0xff]   ;;  %v1023_v8 = vpack.c.bf16 %v4068_v36, %v4068_v36  ;;  %v1026_v11 = vpack.c.bf16 %v4072_v23, %v4072_v23  ;;  %v3389_v14 = vld [vmem:[%s3710_s12 + $0x344] ss:$8 sps:$4 sm:$0xff]   ;;  %v3392_v16 = vld [vmem:[%s3710_s12 + $0x354] ss:$8 sps:$4 sm:$0xff]  }
 0x1aa   : > { %1923 = vmatpush1.bf16.msra.mxu0 %v3327_v19  ;;  %1954 = vmatprep.mubr.bf16.mxu0 %v1024_v39  ;;  %v4084_v44 = vsel %vm4042_vm12, %v742_v25, %v732_v41  ;;  %v4088_v45 = vsel %vm4042_vm12, %v741_v40, %v731_v42  ;;  %v3387_v31 = vld [vmem:[%s3710_s12 + $0x340] ss:$8 sps:$4 sm:$0xff]   ;;  %v3390_v20 = vld [vmem:[%s3710_s12 + $0x350] ss:$8 sps:$4 sm:$0xff]   ;;  %v3395_v28 = vld [vmem:[%s3710_s12 + $0x364] ss:$8 sps:$4 sm:$0xff]  }
 0x1ab   : > { %1924 = vmatprep.subr.bf16.mxu0 %v3332_v21  ;;  %v3393_v18 = vld [vmem:[%s3710_s12 + $0x360] ss:$8 sps:$4 sm:$0xff]   ;;  %v3398_v22 = vld [vmem:[%s3710_s12 + $0x374] ss:$8 sps:$4 sm:$0xff]   ;;  %v3473_v30 = vld [vmem:[%s3720_s20 + $0x4] ss:$40 sps:$4 sm:$0xff]  }
 0x1ac   : > { %v3471_v29 = vld [vmem:[%s3720_s20] ss:$40 sps:$4 sm:$0xff]   ;;  %v3476_v33 = vld [vmem:[%s3720_s20 + $0x54] ss:$40 sps:$4 sm:$0xff]   ;;  %2613 = vmatprep.subr.bf16.mxu1 %v3473_v30  ;;  %v3396_v19 = vld [vmem:[%s3710_s12 + $0x370] ss:$8 sps:$4 sm:$0xff]  }
 0x1ad   : > { %2614 = vmatpush1.bf16.msra.mxu1 %v3471_v29  ;;  %v3474_v17 = vld [vmem:[%s3720_s20 + $0x50] ss:$40 sps:$4 sm:$0xff]   ;;  %v3401_v34 = vld [vmem:[%s3710_s12 + $0x384] ss:$8 sps:$4 sm:$0xff]   ;;  %v3399_v21 = vld [vmem:[%s3710_s12 + $0x380] ss:$8 sps:$4 sm:$0xff]  }
 0x1ae   : > { %1925 = vmatpush1.bf16.msra.mxu0 %v3330_v27  ;;  %2615 = vmatprep.subr.bf16.mxu1 %v3476_v33  ;;  %v3479_v32 = vld [vmem:[%s3720_s20 + $0xa4] ss:$40 sps:$4 sm:$0xff]   ;;  %v3477_v36 = vld [vmem:[%s3720_s20 + $0xa0] ss:$40 sps:$4 sm:$0xff]   ;;  %v3404_v23 = vld [vmem:[%s3710_s12 + $0x394] ss:$8 sps:$4 sm:$0xff]  }
 0x1af   : > { %1926 = vmatprep.subr.bf16.mxu0 %v3335_v43  ;;  %v3482_v39 = vld [vmem:[%s3720_s20 + $0xf4] ss:$40 sps:$4 sm:$0xff]   ;;  %v3402_v25 = vld [vmem:[%s3710_s12 + $0x390] ss:$8 sps:$4 sm:$0xff]   ;;  %v3407_v41 = vld [vmem:[%s3710_s12 + $0x3a4] ss:$8 sps:$4 sm:$0xff]  }
 0x1b0   : > { %v3480_v40 = vld [vmem:[%s3720_s20 + $0xf0] ss:$40 sps:$4 sm:$0xff]   ;;  %v3485_v42 = vld [vmem:[%s3720_s20 + $0x144] ss:$40 sps:$4 sm:$0xff]   ;;  %v3405_v27 = vld [vmem:[%s3710_s12 + $0x3a0] ss:$8 sps:$4 sm:$0xff]  }
 0x1b1   : > { %2616 = vmatpush1.bf16.msra.mxu1 %v3474_v17  ;;  %v3483_v43 = vld [vmem:[%s3720_s20 + $0x140] ss:$40 sps:$4 sm:$0xff]   ;;  %v3486_v17 = vld [vmem:[%s3720_s20 + $0x190] ss:$40 sps:$4 sm:$0xff]  }
 0x1b2   : > { %1927 = vmatpush1.bf16.msra.mxu0 %v3333_v37  ;;  %2617 = vmatprep.subr.bf16.mxu1 %v3479_v32  ;;  %v3410_v37 = vld [vmem:[%s3710_s12 + $0x3b4] ss:$8 sps:$4 sm:$0xff]   ;;  %v3489_v32 = vld [vmem:[%s3720_s20 + $0x1e0] ss:$40 sps:$4 sm:$0xff]  }
 0x1b3   : > { %1928 = vmatprep.subr.bf16.mxu0 %v3338_v35  ;;  %v3408_v35 = vld [vmem:[%s3710_s12 + $0x3b0] ss:$8 sps:$4 sm:$0xff]  }
 0x1b5   : > { %2618 = vmatpush1.bf16.msra.mxu1 %v3477_v36  ;;  %v3497_v36 = vld [vmem:[%s3720_s20 + $0x284] ss:$40 sps:$4 sm:$0xff]  }
 0x1b6   : > { %1929 = vmatpush1.bf16.msra.mxu0 %v3336_v46  ;;  %2619 = vmatprep.subr.bf16.mxu1 %v3482_v39  ;;  %v3413_v46 = vld [vmem:[%s3710_s12 + $0x3c4] ss:$8 sps:$4 sm:$0xff]   ;;  %v3498_v39 = vld [vmem:[%s3720_s20 + $0x2d0] ss:$40 sps:$4 sm:$0xff]  }
 0x1b7   : > { %1930 = vmatprep.subr.bf16.mxu0 %v3341_v47  ;;  %v3411_v47 = vld [vmem:[%s3710_s12 + $0x3c0] ss:$8 sps:$4 sm:$0xff]  }
 0x1b9   : > { %2620 = vmatpush1.bf16.msra.mxu1 %v3480_v40  ;;  %v3503_v40 = vld [vmem:[%s3720_s20 + $0xc] ss:$40 sps:$4 sm:$0xff]  }
 0x1ba   : > { %1931 = vmatpush1.bf16.msra.mxu0 %v3339_v48  ;;  %2621 = vmatprep.subr.bf16.mxu1 %v3485_v42  ;;  %v3416_v48 = vld [vmem:[%s3710_s12 + $0x3d4] ss:$8 sps:$4 sm:$0xff]  }
 0x1bb   : > { %1932 = vmatprep.subr.bf16.mxu0 %v3344_v49  ;;  %v3414_v49 = vld [vmem:[%s3710_s12 + $0x3d0] ss:$8 sps:$4 sm:$0xff]  }
 0x1bd   : > { %2622 = vmatpush1.bf16.msra.mxu1 %v3483_v43  ;;  %v1016_v43 = vld [vmem:[%s3715_s16] sm:$0x3] }
 0x1be   : > { %1933 = vmatpush1.bf16.msra.mxu0 %v3342_v50  ;;  %v3419_v50 = vld [vmem:[%s3710_s12 + $0x3e4] ss:$8 sps:$4 sm:$0xff]  }
 0x1bf   : > { %1934 = vmatprep.subr.bf16.mxu0 %v3347_v51  ;;  %v3417_v51 = vld [vmem:[%s3710_s12 + $0x3e0] ss:$8 sps:$4 sm:$0xff]  }
 0x1c2   : > { %1935 = vmatpush1.bf16.msra.mxu0 %v3345_v52  ;;  %v3422_v52 = vld [vmem:[%s3710_s12 + $0x3f4] ss:$8 sps:$4 sm:$0xff]  }
 0x1c3   : > { %1936 = vmatprep.subr.bf16.mxu0 %v3350_v53  ;;  %v3420_v53 = vld [vmem:[%s3710_s12 + $0x3f0] ss:$8 sps:$4 sm:$0xff]  }
 0x1c6   : > { %1937 = vmatpush1.bf16.msra.mxu0 %v3348_v54  ;;  %v3425_v54 = vld [vmem:[%s3710_s12 + $0x404] ss:$8 sps:$4 sm:$0xff]  }
 0x1c7   : > { %1938 = vmatprep.subr.bf16.mxu0 %v3353_v55  ;;  %v3423_v55 = vld [vmem:[%s3710_s12 + $0x400] ss:$8 sps:$4 sm:$0xff]  }
 0x1ca   : > { %1939 = vmatpush1.bf16.msra.mxu0 %v3351_v56  ;;  %v1025_v56 = vpack.c.bf16 %v4076_v38, %v4076_v38  ;;  %v3434_v38 = vld [vmem:[%s3710_s12 + $0x434] ss:$8 sps:$4 sm:$0xff]  }
 0x1cb   : > { %1940 = vmatprep.subr.bf16.mxu0 %v3356_v57  ;;  %v3428_v57 = vld [vmem:[%s3710_s12 + $0x414] ss:$8 sps:$4 sm:$0xff]  }
 0x1ce   : > { %1941 = vmatpush1.bf16.msra.mxu0 %v3354_v58  ;;  %v1028_v58 = vpack.c.bf16 %v4084_v44, %v4084_v44  ;;  %v3437_v44 = vld [vmem:[%s3710_s12 + $0x444] ss:$8 sps:$4 sm:$0xff]  }
 0x1cf   : > { %1942 = vmatprep.subr.bf16.mxu0 %v3359_v59  ;;  %v3426_v59 = vld [vmem:[%s3710_s12 + $0x410] ss:$8 sps:$4 sm:$0xff]  }
 0x1d2   : > { %1943 = vmatpush1.bf16.msra.mxu0 %v3357_v60  ;;  %v3431_v60 = vld [vmem:[%s3710_s12 + $0x424] ss:$8 sps:$4 sm:$0xff]  }
 0x1d3   : > { %1944 = vmatprep.subr.bf16.mxu0 %v3362_v61  ;;  %v3429_v61 = vld [vmem:[%s3710_s12 + $0x420] ss:$8 sps:$4 sm:$0xff]  }
 0x1d6   : > { %1945 = vmatpush1.bf16.msra.mxu0 %v3360_v62  ;;  %v3432_v62 = vld [vmem:[%s3710_s12 + $0x430] ss:$8 sps:$4 sm:$0xff]  }
 0x1d7   : > { %1946 = vmatprep.subr.bf16.mxu0 %v3365_v63  ;;  %v3435_v63 = vld [vmem:[%s3710_s12 + $0x440] ss:$8 sps:$4 sm:$0xff]  }
 0x1da   : > { %1947 = vmatpush1.bf16.msra.mxu0 %v3363_v0  ;;  %v3440_v0 = vld [vmem:[%s3710_s12 + $0x454] ss:$8 sps:$4 sm:$0xff]  }
 0x1db   : > { %1948 = vmatprep.subr.bf16.mxu0 %v3368_v1  ;;  %v3438_v1 = vld [vmem:[%s3710_s12 + $0x450] ss:$8 sps:$4 sm:$0xff]  }
 0x1de   : > { %1949 = vmatpush1.bf16.msra.mxu0 %v3366_v2  ;;  %v3443_v2 = vld [vmem:[%s3710_s12 + $0x464] ss:$8 sps:$4 sm:$0xff]  }
 0x1df   : > { %1950 = vmatprep.subr.bf16.mxu0 %v3371_v3  ;;  %v3441_v3 = vld [vmem:[%s3710_s12 + $0x460] ss:$8 sps:$4 sm:$0xff]  }
 0x1e2   : > { %1951 = vmatpush1.bf16.msra.mxu0 %v3369_v4  ;;  %v3446_v4 = vld [vmem:[%s3710_s12 + $0x474] ss:$8 sps:$4 sm:$0xff]  }
 0x1e3   : > { %1952 = vmatprep.subr.bf16.mxu0 %v3374_v5  ;;  %v3444_v5 = vld [vmem:[%s3710_s12 + $0x470] ss:$8 sps:$4 sm:$0xff]  }
 0x1e6   : > { %1953 = vmatpush1.bf16.msra.mxu0 %v3372_v6  ;;  %v3449_v6 = vld [vmem:[%s3710_s12 + $0x484] ss:$8 sps:$4 sm:$0xff]  }
 0x1e7   : > { %1963 = vmatprep.subr.bf16.mxu0 %v3377_v7  ;;  %v3447_v7 = vld [vmem:[%s3710_s12 + $0x480] ss:$8 sps:$4 sm:$0xff]  }
 0x1e9   : > { %1955 = vmatmul.mubr.bf16.vlgmr.msra.gmra.mrb[0].mxu0 %v1023_v8  ;;  %v3450_v8 = vld [vmem:[%s3710_s12 + $0x490] ss:$8 sps:$4 sm:$0xff]  }
 0x1ea   : > { %1964 = vmatpush1.bf16.msra.mxu0 %v3375_v9  ;;  %1995 = vmatprep.mubr.bf16.mxu0 %v1026_v11  ;;  %v3452_v9 = vld [vmem:[%s3710_s12 + $0x494] ss:$8 sps:$4 sm:$0xff]   ;;  %v3453_v11 = vld [vmem:[%s3710_s12 + $0x4a0] ss:$8 sps:$4 sm:$0xff]  }
 0x1eb   : > { %1965 = vmatprep.subr.bf16.mxu0 %v3380_v10  ;;  %v3455_v10 = vld [vmem:[%s3710_s12 + $0x4a4] ss:$8 sps:$4 sm:$0xff]  }
 0x1ee   : > { %1966 = vmatpush1.bf16.msra.mxu0 %v3378_v15  ;;  %v3458_v15 = vld [vmem:[%s3710_s12 + $0x4b4] ss:$8 sps:$4 sm:$0xff]  }
 0x1ef   : > { %1967 = vmatprep.subr.bf16.mxu0 %v3383_v24  ;;  %v3456_v24 = vld [vmem:[%s3710_s12 + $0x4b0] ss:$8 sps:$4 sm:$0xff]  }
 0x1f2   : > { %1968 = vmatpush1.bf16.msra.mxu0 %v3381_v26  ;;  %v3461_v26 = vld [vmem:[%s3710_s12 + $0x4c4] ss:$8 sps:$4 sm:$0xff]  }
 0x1f3   : > { %1969 = vmatprep.subr.bf16.mxu0 %v3386_v12  ;;  %v3459_v12 = vld [vmem:[%s3710_s12 + $0x4c0] ss:$8 sps:$4 sm:$0xff]  }
 0x1f6   : > { %1970 = vmatpush1.bf16.msra.mxu0 %v3384_v13  ;;  %v3464_v13 = vld [vmem:[%s3710_s12 + $0x4d4] ss:$8 sps:$4 sm:$0xff]  }
 0x1f7   : > { %1971 = vmatprep.subr.bf16.mxu0 %v3389_v14  ;;  %v3462_v14 = vld [vmem:[%s3710_s12 + $0x4d0] ss:$8 sps:$4 sm:$0xff]  }
 0x1fa   : > { %1972 = vmatpush1.bf16.msra.mxu0 %v3387_v31  ;;  %v3467_v31 = vld [vmem:[%s3710_s12 + $0x4e4] ss:$8 sps:$4 sm:$0xff]  }
 0x1fb   : > { %1973 = vmatprep.subr.bf16.mxu0 %v3392_v16  ;;  %v3465_v16 = vld [vmem:[%s3710_s12 + $0x4e0] ss:$8 sps:$4 sm:$0xff]  }
 0x1fe   : > { %1974 = vmatpush1.bf16.msra.mxu0 %v3390_v20  ;;  %v3470_v20 = vld [vmem:[%s3710_s12 + $0x4f4] ss:$8 sps:$4 sm:$0xff]  }
 0x1ff   : > { %1975 = vmatprep.subr.bf16.mxu0 %v3395_v28  ;;  %v3468_v28 = vld [vmem:[%s3710_s12 + $0x4f0] ss:$8 sps:$4 sm:$0xff]  }
 0x202   : > { %1976 = vmatpush1.bf16.msra.mxu0 %v3393_v18  ;;  %v1027_v18 = vpack.c.bf16 %v4088_v45, %v4088_v45  ;;  %v3492_v45 = vld [vmem:[%s3720_s20 + $0x230] ss:$40 sps:$4 sm:$0xff]  }
 0x203   : > { %1977 = vmatprep.subr.bf16.mxu0 %v3398_v22 }
 0x206   : > { %1978 = vmatpush1.bf16.msra.mxu0 %v3396_v19  ;;  %v3488_v19 = vld [vmem:[%s3720_s20 + $0x194] ss:$40 sps:$4 sm:$0xff]  }
 0x207   : > { %1979 = vmatprep.subr.bf16.mxu0 %v3401_v34  ;;  %2623 = vmatprep.subr.bf16.mxu1 %v3488_v19  ;;  %v3491_v34 = vld [vmem:[%s3720_s20 + $0x1e4] ss:$40 sps:$4 sm:$0xff]   ;;  %v3540_v19 = vld [vmem:[%s3720_s20 + $0x100] ss:$40 sps:$4 sm:$0xff]  }
 0x208   : > { %2624 = vmatpush1.bf16.msra.mxu1 %v3486_v17  ;;  %v3545_v17 = vld [vmem:[%s3720_s20 + $0x154] ss:$40 sps:$4 sm:$0xff]  }
 0x209   : > { %2625 = vmatprep.subr.bf16.mxu1 %v3491_v34  ;;  %v3543_v34 = vld [vmem:[%s3720_s20 + $0x150] ss:$40 sps:$4 sm:$0xff]  }
 0x20a   : > { %1980 = vmatpush1.bf16.msra.mxu0 %v3399_v21  ;;  %v3494_v21 = vld [vmem:[%s3720_s20 + $0x234] ss:$40 sps:$4 sm:$0xff]  }
 0x20b   : > { %1981 = vmatprep.subr.bf16.mxu0 %v3404_v23  ;;  %v3495_v23 = vld [vmem:[%s3720_s20 + $0x280] ss:$40 sps:$4 sm:$0xff]  }
 0x20c   : > { %2626 = vmatpush1.bf16.msra.mxu1 %v3489_v32  ;;  %v3548_v32 = vld [vmem:[%s3720_s20 + $0x1a4] ss:$40 sps:$4 sm:$0xff]  }
 0x20d   : > { %2627 = vmatprep.subr.bf16.mxu1 %v3494_v21  ;;  %v3546_v21 = vld [vmem:[%s3720_s20 + $0x1a0] ss:$40 sps:$4 sm:$0xff]  }
 0x20e   : > { %1982 = vmatpush1.bf16.msra.mxu0 %v3402_v25  ;;  %v3500_v25 = vld [vmem:[%s3720_s20 + $0x2d4] ss:$40 sps:$4 sm:$0xff]  }
 0x20f   : > { %1983 = vmatprep.subr.bf16.mxu0 %v3407_v41  ;;  %v1030_v41 = vlaneseq }
 0x210   : > { %2628 = vmatpush1.bf16.msra.mxu1 %v3492_v45  ;;  %v3551_v45 = vld [vmem:[%s3720_s20 + $0x1f4] ss:$40 sps:$4 sm:$0xff]  }
 0x211   : > { %2629 = vmatprep.subr.bf16.mxu1 %v3497_v36  ;;  %v4212_v42 = vshrl.u32 %v1030_v41, 7  ;;  %v3549_v36 = vld [vmem:[%s3720_s20 + $0x1f0] ss:$40 sps:$4 sm:$0xff]   ;;  %v3560_v41 = vld [vmem:[%s3720_s20 + $0x2e4] ss:$40 sps:$4 sm:$0xff]  }
 0x212   : > { %1984 = vmatpush1.bf16.msra.mxu0 %v3405_v27 }
 0x213   : > { %1985 = vmatprep.subr.bf16.mxu0 %v3410_v37  ;;  %v4215_v27 = vsub.s32 0, %v4212_v42  ;;  %v4219_v37 = vsub.s32 1, %v4212_v42 }
 0x214   : > { %2630 = vmatpush1.bf16.msra.mxu1 %v3495_v23  ;;  %v3554_v23 = vld [vmem:[%s3720_s20 + $0x244] ss:$40 sps:$4 sm:$0xff]  }
 0x215   : > { %2631 = vmatprep.subr.bf16.mxu1 %v3500_v25  ;;  %v3557_v25 = vld [vmem:[%s3720_s20 + $0x294] ss:$40 sps:$4 sm:$0xff]  }
 0x216   : > { %1986 = vmatpush1.bf16.msra.mxu0 %v3408_v35  ;;  %v1033_v35 = vrot.slane %v1016_v43, %v4215_v27 }
 0x217   : > { %1987 = vmatprep.subr.bf16.mxu0 %v3413_v46  ;;  %v1037_v46 = vrot.slane %v1016_v43, %v4219_v37  ;;  %v3558_v43 = vld [vmem:[%s3720_s20 + $0x2e0] ss:$40 sps:$4 sm:$0xff]  }
 0x218   : > { %2632 = vmatpush1.bf16.msra.mxu1 %v3498_v39  ;;  %v3552_v39 = vld [vmem:[%s3720_s20 + $0x240] ss:$40 sps:$4 sm:$0xff]  }
 0x219   : > { %2654 = vmatprep.subr.bf16.mxu1 %v3503_v40  ;;  %v3555_v40 = vld [vmem:[%s3720_s20 + $0x290] ss:$40 sps:$4 sm:$0xff]  }
 0x21a   : > { %1988 = vmatpush1.bf16.msra.mxu0 %v3411_v47 }
 0x21b   : > { %1989 = vmatprep.subr.bf16.mxu0 %v3416_v48 }
 0x21e   : > { %1990 = vmatpush1.bf16.msra.mxu0 %v3414_v49 }
 0x21f   : > { %1991 = vmatprep.subr.bf16.mxu0 %v3419_v50 }
 0x222   : > { %1992 = vmatpush1.bf16.msra.mxu0 %v3417_v51 }
 0x223   : > { %1993 = vmatprep.subr.bf16.mxu0 %v3422_v52 }
 0x226   : > { %1994 = vmatpush1.bf16.msra.mxu0 %v3420_v53 }
 0x227   : > { %2004 = vmatprep.subr.bf16.mxu0 %v3425_v54 }
 0x229   : > { %1996 = vmatmul.mubr.bf16.vlgmr.msra.gmra.mrb[0].mxu0 %v1025_v56 }
 0x22a   : > { %2005 = vmatpush1.bf16.msra.mxu0 %v3423_v55  ;;  %2036 = vmatprep.mubr.bf16.mxu0 %v1028_v58 }
 0x22b   : > { %2006 = vmatprep.subr.bf16.mxu0 %v3428_v57 }
 0x22e   : > { %2007 = vmatpush1.bf16.msra.mxu0 %v3426_v59 }
 0x22f   : > { %2008 = vmatprep.subr.bf16.mxu0 %v3431_v60 }
 0x232   : > { %2009 = vmatpush1.bf16.msra.mxu0 %v3429_v61 }
 0x233   : > { %2010 = vmatprep.subr.bf16.mxu0 %v3434_v38 }
 0x236   : > { %2011 = vmatpush1.bf16.msra.mxu0 %v3432_v62 }
 0x237   : > { %2012 = vmatprep.subr.bf16.mxu0 %v3437_v44 }
 0x23a   : > { %2013 = vmatpush1.bf16.msra.mxu0 %v3435_v63 }
 0x23b   : > { %2014 = vmatprep.subr.bf16.mxu0 %v3440_v0  ;;  %v3501_v0 = vld [vmem:[%s3720_s20 + $0x8] ss:$40 sps:$4 sm:$0xff]  }
 0x23e   : > { %2015 = vmatpush1.bf16.msra.mxu0 %v3438_v1 }
 0x23f   : > { %2016 = vmatprep.subr.bf16.mxu0 %v3443_v2  ;;  %v3506_v2 = vld [vmem:[%s3720_s20 + $0x5c] ss:$40 sps:$4 sm:$0xff]  }
 0x242   : > { %2017 = vmatpush1.bf16.msra.mxu0 %v3441_v3  ;;  %v3504_v3 = vld [vmem:[%s3720_s20 + $0x58] ss:$40 sps:$4 sm:$0xff]  }
 0x243   : > { %2018 = vmatprep.subr.bf16.mxu0 %v3446_v4  ;;  %v3509_v4 = vld [vmem:[%s3720_s20 + $0xac] ss:$40 sps:$4 sm:$0xff]  }
 0x246   : > { %2019 = vmatpush1.bf16.msra.mxu0 %v3444_v5  ;;  %v3507_v5 = vld [vmem:[%s3720_s20 + $0xa8] ss:$40 sps:$4 sm:$0xff]  }
 0x247   : > { %2020 = vmatprep.subr.bf16.mxu0 %v3449_v6  ;;  %v3512_v6 = vld [vmem:[%s3720_s20 + $0xfc] ss:$40 sps:$4 sm:$0xff]  }
 0x24a   : > { %2021 = vmatpush1.bf16.msra.mxu0 %v3447_v7  ;;  %v3510_v7 = vld [vmem:[%s3720_s20 + $0xf8] ss:$40 sps:$4 sm:$0xff]  }
 0x24b   : > { %2022 = vmatprep.subr.bf16.mxu0 %v3452_v9  ;;  %v3515_v9 = vld [vmem:[%s3720_s20 + $0x14c] ss:$40 sps:$4 sm:$0xff]  }
 0x24e   : > { %2023 = vmatpush1.bf16.msra.mxu0 %v3450_v8  ;;  %v3513_v8 = vld [vmem:[%s3720_s20 + $0x148] ss:$40 sps:$4 sm:$0xff]  }
 0x24f   : > { %2024 = vmatprep.subr.bf16.mxu0 %v3455_v10  ;;  %v3518_v10 = vld [vmem:[%s3720_s20 + $0x19c] ss:$40 sps:$4 sm:$0xff]  }
 0x252   : > { %2025 = vmatpush1.bf16.msra.mxu0 %v3453_v11  ;;  %v3516_v11 = vld [vmem:[%s3720_s20 + $0x198] ss:$40 sps:$4 sm:$0xff]  }
 0x253   : > { %2026 = vmatprep.subr.bf16.mxu0 %v3458_v15  ;;  %v3521_v15 = vld [vmem:[%s3720_s20 + $0x1ec] ss:$40 sps:$4 sm:$0xff]  }
 0x256   : > { %2027 = vmatpush1.bf16.msra.mxu0 %v3456_v24  ;;  %v3519_v24 = vld [vmem:[%s3720_s20 + $0x1e8] ss:$40 sps:$4 sm:$0xff]  }
 0x257   : > { %2028 = vmatprep.subr.bf16.mxu0 %v3461_v26  ;;  %v3524_v26 = vld [vmem:[%s3720_s20 + $0x23c] ss:$40 sps:$4 sm:$0xff]  }
 0x25a   : > { %2029 = vmatpush1.bf16.msra.mxu0 %v3459_v12  ;;  %v3522_v12 = vld [vmem:[%s3720_s20 + $0x238] ss:$40 sps:$4 sm:$0xff]  }
 0x25b   : > { %2030 = vmatprep.subr.bf16.mxu0 %v3464_v13  ;;  %v3527_v13 = vld [vmem:[%s3720_s20 + $0x28c] ss:$40 sps:$4 sm:$0xff]  }
 0x25e   : > { %2031 = vmatpush1.bf16.msra.mxu0 %v3462_v14  ;;  %v3525_v14 = vld [vmem:[%s3720_s20 + $0x288] ss:$40 sps:$4 sm:$0xff]  }
 0x25f   : > { %2032 = vmatprep.subr.bf16.mxu0 %v3467_v31  ;;  %v3530_v31 = vld [vmem:[%s3720_s20 + $0x2dc] ss:$40 sps:$4 sm:$0xff]  }
 0x262   : > { %2033 = vmatpush1.bf16.msra.mxu0 %v3465_v16  ;;  %v3528_v16 = vld [vmem:[%s3720_s20 + $0x2d8] ss:$40 sps:$4 sm:$0xff]  }
 0x263   : > { %2034 = vmatprep.subr.bf16.mxu0 %v3470_v20  ;;  %v3533_v20 = vld [vmem:[%s3720_s20 + $0x14] ss:$40 sps:$4 sm:$0xff]  }
 0x266   : > { %2035 = vmatpush1.bf16.msra.mxu0 %v3468_v28  ;;  %v3531_v28 = vld [vmem:[%s3720_s20 + $0x10] ss:$40 sps:$4 sm:$0xff]  }
 0x269   : > { %2037 = vmatmul.mubr.bf16.vlgmr.msra.gmra.mrb[0].mxu0 %v1027_v18  ;;  %v3536_v18 = vld [vmem:[%s3720_s20 + $0x64] ss:$40 sps:$4 sm:$0xff]  }
 0x27c   : > { %v1874_v22 = vpop.f32.mrb[0].mxu1 }
 0x27d   : > { %v1876_v29 = vpop.f32.mrb[1].mxu1  ;;  %v1875_v47 = vadd.f32 %v1874_v22, %v1033_v35  ;;  %v3534_v22 = vld [vmem:[%s3720_s20 + $0x60] ss:$40 sps:$4 sm:$0xff]   ;;  %v3563_v35 = vld [vmem:[%s3720_s20 + $0x1c] ss:$40 sps:$4 sm:$0xff]  }
 0x27e   : > { %v1878_v30 = vpop.f32.mrb[2].mxu1  ;;  %v1877_v48 = vadd.f32 %v1876_v29, %v1037_v46  ;;  %v3539_v29 = vld [vmem:[%s3720_s20 + $0xb4] ss:$40 sps:$4 sm:$0xff]   ;;  %v3561_v46 = vld [vmem:[%s3720_s20 + $0x18] ss:$40 sps:$4 sm:$0xff]  }
 0x27f   : > { %v1879_v33 = vpop.f32.mrb[3].mxu1  ;;  %v3537_v30 = vld [vmem:[%s3720_s20 + $0xb0] ss:$40 sps:$4 sm:$0xff]  }
 0x280   : > { %v3542_v33 = vld [vmem:[%s3720_s20 + $0x104] ss:$40 sps:$4 sm:$0xff]  }
 0x33c   : > { %v2038_v49 = vpop.f32.mrb[0].mxu0 }
 0x33d   : > { %v3201_v50 = vadd.f32 %v2038_v49, %v1875_v47  ;;  %v2040_v51 = vpop.f32.mrb[1].mxu0  ;;  %v3566_v47 = vld [vmem:[%s3720_s20 + $0x6c] ss:$40 sps:$4 sm:$0xff]   ;;  %v3569_v49 = vld [vmem:[%s3720_s20 + $0xbc] ss:$40 sps:$4 sm:$0xff]  }
 0x33e   : > { %v3203_v52 = vadd.f32 %v2040_v51, %v1877_v48  ;;  %v2042_v53 = vpop.f32.mrb[2].mxu0  ;;  %v3564_v48 = vld [vmem:[%s3720_s20 + $0x68] ss:$40 sps:$4 sm:$0xff]   ;;  %v3572_v51 = vld [vmem:[%s3720_s20 + $0x10c] ss:$40 sps:$4 sm:$0xff]  }
 0x33f   : > { %v2047_v54 = vmul.f32 0.70710677, %v3201_v50  ;;  %v2043_v55 = vpop.f32.mrb[3].mxu0  ;;  %v2045_v59 = vmul.f32 0.5, %v3201_v50  ;;  %v3567_v50 = vld [vmem:[%s3720_s20 + $0xb8] ss:$40 sps:$4 sm:$0xff]  }
 0x340   : > { %v2048_v56 = vmul.f32 0.70710677, %v3203_v52  ;;  %v2046_v61 = vmul.f32 0.5, %v3203_v52  ;;  %v3570_v52 = vld [vmem:[%s3720_s20 + $0x108] ss:$40 sps:$4 sm:$0xff]  }
 0x341   : > { %3623 = verf.f32 %v2047_v54  ;;  %v3575_v53 = vld [vmem:[%s3720_s20 + $0x15c] ss:$40 sps:$4 sm:$0xff]   ;;  %v3573_v54 = vld [vmem:[%s3720_s20 + $0x158] ss:$40 sps:$4 sm:$0xff]   ;;  %v3578_v55 = vld [vmem:[%s3720_s20 + $0x1ac] ss:$40 sps:$4 sm:$0xff]  }
 0x342   : > { %3625 = verf.f32 %v2048_v56  ;;  %v3576_v56 = vld [vmem:[%s3720_s20 + $0x1a8] ss:$40 sps:$4 sm:$0xff]  }
 0x34b   : > { %v3624_v57 = vpop.eup %3623 }
 0x34c   : > { %v3626_v58 = vpop.eup %3625  ;;  %v2051_v60 = vadd.f32 1.0, %v3624_v57  ;;  %v3581_v57 = vld [vmem:[%s3720_s20 + $0x1fc] ss:$40 sps:$4 sm:$0xff]  }
 0x34d   : > { %v2052_v38 = vadd.f32 1.0, %v3626_v58  ;;  %v3579_v58 = vld [vmem:[%s3720_s20 + $0x1f8] ss:$40 sps:$4 sm:$0xff]  }
 0x34e   : > { %v2053_v62 = vmul.f32 %v2051_v60, %v2045_v59  ;;  %v3584_v59 = vld [vmem:[%s3720_s20 + $0x24c] ss:$40 sps:$4 sm:$0xff]   ;;  %v3582_v60 = vld [vmem:[%s3720_s20 + $0x248] ss:$40 sps:$4 sm:$0xff]  }
 0x34f   : > { %v2054_v44 = vmul.f32 %v2052_v38, %v2046_v61  ;;  %v3587_v61 = vld [vmem:[%s3720_s20 + $0x29c] ss:$40 sps:$4 sm:$0xff]   ;;  %v3585_v38 = vld [vmem:[%s3720_s20 + $0x298] ss:$40 sps:$4 sm:$0xff]  }
 0x350   : > { %v4226_v1 = vpack.c.bf16 %v2053_v62, %v2053_v62  ;;  %v3590_v62 = vld [vmem:[%s3720_s20 + $0x2ec] ss:$40 sps:$4 sm:$0xff]  }
 0x351   : > { %v4223_v63 = vpack.c.bf16 %v2054_v44, %v2054_v44  ;;  %v3588_v44 = vld [vmem:[%s3720_s20 + $0x2e8] ss:$40 sps:$4 sm:$0xff]  }
 0x353   : > { %3193 = vmatprep.mubr.msk.bf16.mxu1 %vm2609_vm13, %v4223_v63 }
 0x354   : > { %2646 = vmatmul.mubr.bf16.vlgmr.msra.gmra.mrb[4].mxu1 %v4226_v1 }
 0x355   : > { %2655 = vmatpush1.bf16.msra.mxu1 %v3501_v0  ;;  %3194 = vmatprep.mubr.msk.bf16.mxu1 %vm2609_vm13, %v4223_v63  ;;  %v3593_v0 = vld [vmem:[%s3720_s20 + $0x24] ss:$40 sps:$4 sm:$0xff]  }
 0x356   : > { %2656 = vmatprep.subr.bf16.mxu1 %v3506_v2  ;;  %v3591_v2 = vld [vmem:[%s3720_s20 + $0x20] ss:$40 sps:$4 sm:$0xff]  }
 0x359   : > { %2657 = vmatpush1.bf16.msra.mxu1 %v3504_v3  ;;  %v3596_v3 = vld [vmem:[%s3720_s20 + $0x74] ss:$40 sps:$4 sm:$0xff]  }
 0x35a   : > { %2658 = vmatprep.subr.bf16.mxu1 %v3509_v4  ;;  %v3594_v4 = vld [vmem:[%s3720_s20 + $0x70] ss:$40 sps:$4 sm:$0xff]  }
 0x35d   : > { %2659 = vmatpush1.bf16.msra.mxu1 %v3507_v5  ;;  %v3599_v5 = vld [vmem:[%s3720_s20 + $0xc4] ss:$40 sps:$4 sm:$0xff]  }
 0x35e   : > { %2660 = vmatprep.subr.bf16.mxu1 %v3512_v6  ;;  %v3597_v6 = vld [vmem:[%s3720_s20 + $0xc0] ss:$40 sps:$4 sm:$0xff]  }
 0x361   : > { %2661 = vmatpush1.bf16.msra.mxu1 %v3510_v7  ;;  %v3602_v7 = vld [vmem:[%s3720_s20 + $0x114] ss:$40 sps:$4 sm:$0xff]  }
 0x362   : > { %2662 = vmatprep.subr.bf16.mxu1 %v3515_v9  ;;  %v3600_v9 = vld [vmem:[%s3720_s20 + $0x110] ss:$40 sps:$4 sm:$0xff]  }
 0x365   : > { %2663 = vmatpush1.bf16.msra.mxu1 %v3513_v8  ;;  %v3605_v8 = vld [vmem:[%s3720_s20 + $0x164] ss:$40 sps:$4 sm:$0xff]  }
 0x366   : > { %2664 = vmatprep.subr.bf16.mxu1 %v3518_v10  ;;  %v3603_v10 = vld [vmem:[%s3720_s20 + $0x160] ss:$40 sps:$4 sm:$0xff]  }
 0x369   : > { %2665 = vmatpush1.bf16.msra.mxu1 %v3516_v11  ;;  %v3606_v11 = vld [vmem:[%s3720_s20 + $0x1b0] ss:$40 sps:$4 sm:$0xff]  }
 0x36a   : > { %2666 = vmatprep.subr.bf16.mxu1 %v3521_v15  ;;  %v3611_v15 = vld [vmem:[%s3720_s20 + $0x204] ss:$40 sps:$4 sm:$0xff]  }
 0x36d   : > { %2667 = vmatpush1.bf16.msra.mxu1 %v3519_v24  ;;  %v3609_v24 = vld [vmem:[%s3720_s20 + $0x200] ss:$40 sps:$4 sm:$0xff]  }
 0x36e   : > { %2668 = vmatprep.subr.bf16.mxu1 %v3524_v26  ;;  %v3614_v26 = vld [vmem:[%s3720_s20 + $0x254] ss:$40 sps:$4 sm:$0xff]  }
 0x371   : > { %2669 = vmatpush1.bf16.msra.mxu1 %v3522_v12  ;;  %v3612_v12 = vld [vmem:[%s3720_s20 + $0x250] ss:$40 sps:$4 sm:$0xff]  }
 0x372   : > { %2670 = vmatprep.subr.bf16.mxu1 %v3527_v13  ;;  %v3617_v13 = vld [vmem:[%s3720_s20 + $0x2a4] ss:$40 sps:$4 sm:$0xff]  }
 0x375   : > { %2671 = vmatpush1.bf16.msra.mxu1 %v3525_v14  ;;  %v3615_v14 = vld [vmem:[%s3720_s20 + $0x2a0] ss:$40 sps:$4 sm:$0xff]  }
 0x376   : > { %2672 = vmatprep.subr.bf16.mxu1 %v3530_v31  ;;  %v3620_v31 = vld [vmem:[%s3720_s20 + $0x2f4] ss:$40 sps:$4 sm:$0xff]  }
 0x379   : > { %2673 = vmatpush1.bf16.msra.mxu1 %v3528_v16  ;;  %v3618_v16 = vld [vmem:[%s3720_s20 + $0x2f0] ss:$40 sps:$4 sm:$0xff]  }
 0x37a   : > { %2695 = vmatprep.subr.bf16.mxu1 %v3533_v20  ;;  %v1017_v20 = vld [vmem:[%s3715_s16 + $0x2] sm:$0xff] }
 0x37c   : > { %2687 = vmatmul.mubr.bf16.vlgmr.msra.gmra.mrb[8].mxu1 %v4226_v1 }
 0x37d   : > { %2696 = vmatpush1.bf16.msra.mxu1 %v3531_v28  ;;  %3195 = vmatprep.mubr.msk.bf16.mxu1 %vm2609_vm13, %v4223_v63  ;;  %v2062_v28 = vrot.slane %v1017_v20, %v4215_v27 }
 0x37e   : > { %2697 = vmatprep.subr.bf16.mxu1 %v3536_v18  ;;  %v2066_v18 = vrot.slane %v1017_v20, %v4219_v37 }
 0x381   : > { %2698 = vmatpush1.bf16.msra.mxu1 %v3534_v22 }
 0x382   : > { %2699 = vmatprep.subr.bf16.mxu1 %v3539_v29 }
 0x385   : > { %2700 = vmatpush1.bf16.msra.mxu1 %v3537_v30 }
 0x386   : > { %2701 = vmatprep.subr.bf16.mxu1 %v3542_v33 }
 0x389   : > { %2702 = vmatpush1.bf16.msra.mxu1 %v3540_v19 }
 0x38a   : > { %2703 = vmatprep.subr.bf16.mxu1 %v3545_v17 }
 0x38d   : > { %2704 = vmatpush1.bf16.msra.mxu1 %v3543_v34  ;;  %v2069_v34 = vsub.s32 2, %v4212_v42 }
 0x38e   : > { %2705 = vmatprep.subr.bf16.mxu1 %v3548_v32 }
 0x38f   : > { %v2070_v32 = vrot.slane %v1017_v20, %v2069_v34 }
 0x391   : > { %2706 = vmatpush1.bf16.msra.mxu1 %v3546_v21 }
 0x392   : > { %2707 = vmatprep.subr.bf16.mxu1 %v3551_v45 }
 0x395   : > { %2708 = vmatpush1.bf16.msra.mxu1 %v3549_v36 }
 0x396   : > { %2709 = vmatprep.subr.bf16.mxu1 %v3554_v23 }
 0x399   : > { %2710 = vmatpush1.bf16.msra.mxu1 %v3552_v39 }
 0x39a   : > { %2711 = vmatprep.subr.bf16.mxu1 %v3557_v25 }
 0x39d   : > { %2712 = vmatpush1.bf16.msra.mxu1 %v3555_v40 }
 0x39e   : > { %2713 = vmatprep.subr.bf16.mxu1 %v3560_v41  ;;  %v2077_v41 = vsub.s32 4, %v4212_v42 }
 0x3a1   : > { %2714 = vmatpush1.bf16.msra.mxu1 %v3558_v43  ;;  %v2081_v43 = vsub.s32 5, %v4212_v42 }
 0x3a2   : > { %2736 = vmatprep.subr.bf16.mxu1 %v3563_v35  ;;  %v2078_v35 = vrot.slane %v1017_v20, %v2077_v41 }
 0x3a4   : > { %2728 = vmatmul.mubr.bf16.vlgmr.msra.gmra.mrb[12].mxu1 %v4226_v1 }
 0x3a5   : > { %2737 = vmatpush1.bf16.msra.mxu1 %v3561_v46  ;;  %3196 = vmatprep.mubr.msk.bf16.mxu1 %vm2609_vm13, %v4223_v63  ;;  %v2082_v46 = vrot.slane %v1017_v20, %v2081_v43 }
 0x3a6   : > { %2738 = vmatprep.subr.bf16.mxu1 %v3566_v47 }
 0x3a9   : > { %2739 = vmatpush1.bf16.msra.mxu1 %v3564_v48 }
 0x3aa   : > { %2740 = vmatprep.subr.bf16.mxu1 %v3569_v49 }
 0x3ad   : > { %2741 = vmatpush1.bf16.msra.mxu1 %v3567_v50 }
 0x3ae   : > { %2742 = vmatprep.subr.bf16.mxu1 %v3572_v51 }
 0x3b1   : > { %2743 = vmatpush1.bf16.msra.mxu1 %v3570_v52 }
 0x3b2   : > { %2744 = vmatprep.subr.bf16.mxu1 %v3575_v53  ;;  %v2085_v53 = vsub.s32 6, %v4212_v42 }
 0x3b5   : > { %2745 = vmatpush1.bf16.msra.mxu1 %v3573_v54  ;;  %v2089_v54 = vsub.s32 7, %v4212_v42 }
 0x3b6   : > { %2746 = vmatprep.subr.bf16.mxu1 %v3578_v55  ;;  %v2086_v55 = vrot.slane %v1017_v20, %v2085_v53 }
 0x3b9   : > { %2747 = vmatpush1.bf16.msra.mxu1 %v3576_v56  ;;  %v2090_v56 = vrot.slane %v1017_v20, %v2089_v54 }
 0x3ba   : > { %2748 = vmatprep.subr.bf16.mxu1 %v3581_v57 }
 0x3bd   : > { %2749 = vmatpush1.bf16.msra.mxu1 %v3579_v58 }
 0x3be   : > { %2750 = vmatprep.subr.bf16.mxu1 %v3584_v59 }
 0x3c1   : > { %2751 = vmatpush1.bf16.msra.mxu1 %v3582_v60 }
 0x3c2   : > { %2752 = vmatprep.subr.bf16.mxu1 %v3587_v61 }
 0x3c5   : > { %2753 = vmatpush1.bf16.msra.mxu1 %v3585_v38 }
 0x3c6   : > { %2754 = vmatprep.subr.bf16.mxu1 %v3590_v62  ;;  %v1018_v62 = vld [vmem:[%s3715_s16 + $0xa] sm:$0x3] }
 0x3c9   : > { %2755 = vmatpush1.bf16.msra.mxu1 %v3588_v44  ;;  %v2094_v44 = vrot.slane %v1018_v62, %v4215_v27 }
 0x3ca   : > { %2777 = vmatprep.subr.bf16.mxu1 %v3593_v0  ;;  %v2098_v0 = vrot.slane %v1018_v62, %v4219_v37 }
 0x3cc   : > { %2769 = vmatmul.mubr.bf16.vlgmr.msra.gmra.mrb[16].mxu1 %v4226_v1 }
 0x3cd   : > { %2778 = vmatpush1.bf16.msra.mxu1 %v3591_v2  ;;  %3197 = vmatprep.mubr.msk.bf16.mxu1 %vm2609_vm13, %v4223_v63  ;;  %v3608_v63 = vld [vmem:[%s3720_s20 + $0x1b4] ss:$40 sps:$4 sm:$0xff]  }
 0x3ce   : > { %2779 = vmatprep.subr.bf16.mxu1 %v3596_v3 }
 0x3d1   : > { %2780 = vmatpush1.bf16.msra.mxu1 %v3594_v4 }
 0x3d2   : > { %2781 = vmatprep.subr.bf16.mxu1 %v3599_v5 }
 0x3d5   : > { %2782 = vmatpush1.bf16.msra.mxu1 %v3597_v6 }
 0x3d6   : > { %2783 = vmatprep.subr.bf16.mxu1 %v3602_v7 }
 0x3d9   : > { %2784 = vmatpush1.bf16.msra.mxu1 %v3600_v9 }
 0x3da   : > { %2785 = vmatprep.subr.bf16.mxu1 %v3605_v8 }
 0x3dd   : > { %2786 = vmatpush1.bf16.msra.mxu1 %v3603_v10 }
 0x3de   : > { %2787 = vmatprep.subr.bf16.mxu1 %v3608_v63 }
 0x3e1   : > { %2788 = vmatpush1.bf16.msra.mxu1 %v3606_v11 }
 0x3e2   : > { %2789 = vmatprep.subr.bf16.mxu1 %v3611_v15 }
 0x3e5   : > { %2790 = vmatpush1.bf16.msra.mxu1 %v3609_v24 }
 0x3e6   : > { %2791 = vmatprep.subr.bf16.mxu1 %v3614_v26 }
 0x3e9   : > { %2792 = vmatpush1.bf16.msra.mxu1 %v3612_v12 }
 0x3ea   : > { %2793 = vmatprep.subr.bf16.mxu1 %v3617_v13 }
 0x3ed   : > { %2794 = vmatpush1.bf16.msra.mxu1 %v3615_v14 }
 0x3ee   : > { %2795 = vmatprep.subr.bf16.mxu1 %v3620_v31 }
 0x3f1   : > { %2796 = vmatpush1.bf16.msra.mxu1 %v3618_v16 }
 0x3f4   : > { %2810 = vmatmul.mubr.bf16.vlgmr.msra.gmra.mrb[20].mxu1 %v4226_v1  ;;  %v2073_v1 = vsub.s32 3, %v4212_v42 }
 0x3f6   : > { %v2074_v21 = vrot.slane %v1017_v20, %v2073_v1 }
 0x427   : > { %v2647_v22 = vpop.f32.mrb[4].mxu1 }
 0x428   : > { %v2648_v29 = vadd.f32 %v2647_v22, %v2062_v28  ;;  %v2649_v30 = vpop.f32.mrb[5].mxu1 }
 0x429   : > { %v2650_v33 = vadd.f32 %v2649_v30, %v2066_v18  ;;  %v2651_v19 = vpop.f32.mrb[6].mxu1 }
 0x42a   : > { %2818 = vst [vmem:[%s3725_s23] sm:$0xff] %v2648_v29  ;;  %2828 = vst [vmem:[#allocation2] sm:$0xff] %v2648_v29  ;;  %v2652_v17 = vpop.f32.mrb[7].mxu1 }
 0x42b   : > { %2819 = vst [vmem:[%s3725_s23 + $0x8] sm:$0xff] %v2650_v33  ;;  %2829 = vst [vmem:[#allocation2 + $0x8] sm:$0xff] %v2650_v33 }
 0x44f   : > { %v2688_v45 = vpop.f32.mrb[8].mxu1 }
 0x450   : > { %v2689_v36 = vadd.f32 %v2688_v45, %v2070_v32  ;;  %v2690_v23 = vpop.f32.mrb[9].mxu1 }
 0x451   : > { %v2691_v39 = vadd.f32 %v2690_v23, %v2074_v21  ;;  %v2692_v25 = vpop.f32.mrb[10].mxu1 }
 0x452   : > { %2820 = vst [vmem:[%s3725_s23 + $0x10] sm:$0xff] %v2689_v36  ;;  %2830 = vst [vmem:[#allocation2 + $0x10] sm:$0xff] %v2689_v36  ;;  %v2693_v40 = vpop.f32.mrb[11].mxu1 }
 0x453   : > { %2821 = vst [vmem:[%s3725_s23 + $0x18] sm:$0xff] %v2691_v39  ;;  %2831 = vst [vmem:[#allocation2 + $0x18] sm:$0xff] %v2691_v39 }
 0x477   : > { %v2729_v47 = vpop.f32.mrb[12].mxu1 }
 0x478   : > { %v2730_v48 = vadd.f32 %v2729_v47, %v2078_v35  ;;  %v2731_v49 = vpop.f32.mrb[13].mxu1 }
 0x479   : > { %v2732_v50 = vadd.f32 %v2731_v49, %v2082_v46  ;;  %v2733_v51 = vpop.f32.mrb[14].mxu1 }
 0x47a   : > { %2822 = vst [vmem:[%s3725_s23 + $0x20] sm:$0xff] %v2730_v48  ;;  %2832 = vst [vmem:[#allocation2 + $0x20] sm:$0xff] %v2730_v48  ;;  %v2734_v52 = vpop.f32.mrb[15].mxu1 }
 0x47b   : > { %2823 = vst [vmem:[%s3725_s23 + $0x28] sm:$0xff] %v2732_v50  ;;  %2833 = vst [vmem:[#allocation2 + $0x28] sm:$0xff] %v2732_v50 }
 0x49f   : > { %v2770_v57 = vpop.f32.mrb[16].mxu1 }
 0x4a0   : > { %v2771_v58 = vadd.f32 %v2770_v57, %v2086_v55  ;;  %v2772_v59 = vpop.f32.mrb[17].mxu1 }
 0x4a1   : > { %v2773_v60 = vadd.f32 %v2772_v59, %v2090_v56  ;;  %v2774_v61 = vpop.f32.mrb[18].mxu1 }
 0x4a2   : > { %2824 = vst [vmem:[%s3725_s23 + $0x30] sm:$0xff] %v2771_v58  ;;  %2834 = vst [vmem:[#allocation2 + $0x30] sm:$0xff] %v2771_v58  ;;  %v2775_v38 = vpop.f32.mrb[19].mxu1 }
 0x4a3   : > { %2825 = vst [vmem:[%s3725_s23 + $0x38] sm:$0xff] %v2773_v60  ;;  %2835 = vst [vmem:[#allocation2 + $0x38] sm:$0xff] %v2773_v60 }
 0x4c7   : > { %v2811_v42 = vpop.f32.mrb[20].mxu1 }
 0x4c8   : > { %v2812_v2 = vadd.f32 %v2811_v42, %v2094_v44  ;;  %v2813_v3 = vpop.f32.mrb[21].mxu1 }
 0x4c9   : > { %v2814_v4 = vadd.f32 %v2813_v3, %v2098_v0  ;;  %v2815_v5 = vpop.f32.mrb[22].mxu1 }
 0x4ca   : > { %2826 = vst [vmem:[%s3725_s23 + $0x40] sm:$0xff] %v2812_v2  ;;  %2836 = vst [vmem:[#allocation2 + $0x40] sm:$0xff] %v2812_v2  ;;  %v2816_v6 = vpop.f32.mrb[23].mxu1 }
 0x4cb   : > { %2827 = vst [vmem:[%s3725_s23 + $0x48] sm:$0xff] %v2814_v4  ;;  %2837 = vst [vmem:[#allocation2 + $0x48] sm:$0xff] %v2814_v4 }
 0x4cc PF: > { %s23_s29 = sadd.s32 1, %s3647_s29  }
 0x4cd   : > { %p20_p6 = scmp.ge.s32.totalorder %s23_s29, 5  }
 0x4cf   :  { %22 = sbr.rel (!%p20_p6) target bundleno = 16 (0x10), region = 88 }

</bundles_post_ra>
